<compile_context>
chip_gen: v7x
topology: tpu7x:2x2x1
jax: 0.10.0
libtpu: 0.0.40
codegen_flags: <defaults>
</compile_context>

<pallas_src>
import jax
import jax.numpy as jnp
from jax.experimental import pallas as pl
from jax.experimental.pallas import tpu as pltpu

# Model sizes (TPU-tile friendly: multiples of (8, 128)).
F_BINS = 128          # frequency bins per frame
HIDDEN = 128          # hidden layer width
DEFAULT_TB = 256      # batch tile (fills the MXU M dimension)
EPS = 1e-8


def _generator_kernel(x_ref,
                      w1_ref, b1_ref,
                      w2_ref, b2_ref,
                      w3_ref, b3_ref,
                      w4_ref, b4_ref,
                      out_ref):
    """Fused SVSGAN generator forward for one batch tile.

    x_ref   : [TB, F]      input magnitude frames (f32)
    w*_ref  : bf16 dense weights (wi: [in, out]); b*_ref: f32 bias [1, out]
    out_ref : [TB, 2*F]    concatenated (y1 | y2) masked source estimates
    """
    x_f32 = x_ref[...].astype(jnp.float32)
    x_bf = x_f32.astype(jnp.bfloat16)

    # FC1 + ReLU   (bf16 MXU inputs, f32 accumulation)
    h = jnp.dot(x_bf, w1_ref[...], preferred_element_type=jnp.float32) + b1_ref[...]
    h = jnp.maximum(h, 0.0).astype(jnp.bfloat16)
    # FC2 + ReLU
    h = jnp.dot(h, w2_ref[...], preferred_element_type=jnp.float32) + b2_ref[...]
    h = jnp.maximum(h, 0.0).astype(jnp.bfloat16)
    # FC3 + ReLU
    h = jnp.dot(h, w3_ref[...], preferred_element_type=jnp.float32) + b3_ref[...]
    h = jnp.maximum(h, 0.0).astype(jnp.bfloat16)
    # Output layer -> 2*F non-negative source magnitudes (f32 for masking)
    o = jnp.dot(h, w4_ref[...], preferred_element_type=jnp.float32) + b4_ref[...]
    o = jnp.maximum(o, 0.0)

    # Time-frequency ratio masking layer (approx reciprocal -> EUP slot).
    o1 = o[:, :F_BINS]
    o2 = o[:, F_BINS:]
    inv_den = pl.reciprocal(o1 + o2 + EPS, approx=True)         # [TB, F]
    scale = jnp.tile(inv_den * x_f32, (1, 2))                   # [TB, 2F]

    # Single lane-dense [TB, 2F] store: (y1 | y2) = o * x / (o1 + o2 + eps).
    out_ref[...] = (o * scale).astype(out_ref.dtype)


def svsgan_generator(x, params, *, tb=DEFAULT_TB):
    """x: [B, F_BINS] f32 magnitude frames. Returns (y1, y2), each [B, F_BINS]."""
    B, F = x.shape
    assert F == F_BINS

    w1, b1, w2, b2, w3, b3, w4, b4 = params
    # bf16 weights for the MXU fast path (f32 accumulation in-kernel).
    w1b, w2b, w3b, w4b = (w.astype(jnp.bfloat16) for w in (w1, w2, w3, w4))

    # Clamp / align the batch tile, pad batch to a multiple of it.
    tb = max(8, min(tb, ((B + 7) // 8) * 8))
    num_tiles = pl.cdiv(B, tb)
    padded_b = num_tiles * tb
    if padded_b != B:
        x = jnp.pad(x, ((0, padded_b - B), (0, 0)))

    def rep(arr):
        # weight / bias blocks: full array, same (resident) block every step
        return pl.BlockSpec(arr.shape, lambda i: (0, 0))

    weight_bytes = (sum(int(w.size) * 2 for w in (w1b, w2b, w3b, w4b))
                    + sum(int(b.size) * 4 for b in (b1, b2, b3, b4)))
    cost = pl.CostEstimate(
        flops=2 * padded_b * F_BINS * (3 * HIDDEN + 2 * F_BINS),
        transcendentals=padded_b * F_BINS,
        bytes_accessed=(padded_b * F_BINS * 4          # x in
                        + padded_b * 2 * F_BINS * 4    # fused output
                        + weight_bytes),
    )

    out = pl.pallas_call(
        _generator_kernel,
        out_shape=jax.ShapeDtypeStruct((padded_b, 2 * F_BINS), x.dtype),
        grid_spec=pltpu.PrefetchScalarGridSpec(
            num_scalar_prefetch=0,
            grid=(num_tiles,),
            in_specs=[
                pl.BlockSpec((tb, F_BINS), lambda i: (i, 0)),   # x tile
                rep(w1b), rep(b1),
                rep(w2b), rep(b2),
                rep(w3b), rep(b3),
                rep(w4b), rep(b4),
            ],
            out_specs=pl.BlockSpec((tb, 2 * F_BINS), lambda i: (i, 0)),
        ),
        compiler_params=pltpu.CompilerParams(
            dimension_semantics=("parallel",)),
        cost_estimate=cost,
    )(x, w1b, b1, w2b, b2, w3b, b3, w4b, b4)

    # Wrapper-side split of the fused lane-dense output (free layout plumbing).
    return out[:B, :F_BINS], out[:B, F_BINS:]


def init_params(key):
    """Deterministic synthetic weights (glorot-ish scaling), stored in f32."""
    ks = jax.random.split(key, 4)

    def dense(k, fan_in, fan_out):
        scale = (2.0 / (fan_in + fan_out)) ** 0.5
        w = scale * jax.random.normal(k, (fan_in, fan_out), dtype=jnp.float32)
        b = jnp.zeros((1, fan_out), dtype=jnp.float32)
        return w, b

    w1, b1 = dense(ks[0], F_BINS, HIDDEN)
    w2, b2 = dense(ks[1], HIDDEN, HIDDEN)
    w3, b3 = dense(ks[2], HIDDEN, HIDDEN)
    w4, b4 = dense(ks[3], HIDDEN, 2 * F_BINS)
    return (w1, b1, w2, b2, w3, b3, w4, b4)


def reference_forward(x, params):
    """Pure-JAX reference using the same bf16 weight/activation path."""
    w1, b1, w2, b2, w3, b3, w4, b4 = params

    def dense_relu(a, w, b):
        y = jnp.dot(a.astype(jnp.bfloat16), w.astype(jnp.bfloat16),
                    preferred_element_type=jnp.float32) + b
        return jnp.maximum(y, 0.0)

    h = dense_relu(x, w1, b1)
    h = dense_relu(h, w2, b2)
    h = dense_relu(h, w3, b3)
    o = dense_relu(h, w4, b4)
    o1, o2 = o[:, :F_BINS], o[:, F_BINS:]
    den = o1 + o2 + EPS
    return (o1 / den) * x, (o2 / den) * x


if __name__ == "__main__":
    key = jax.random.PRNGKey(0)
    k_x, k_p = jax.random.split(key)

    # 512 frames -> 2 grid steps of TB=256 (keeps both v7x TensorCores busy);
    # total data is still tiny (~256 KiB input).
    B = 512
    # magnitude spectrogram frames -> non-negative inputs
    x = jnp.abs(jax.random.normal(k_x, (B, F_BINS), dtype=jnp.float32))
    params = init_params(k_p)

    y1, y2 = svsgan_generator(x, params)
    jax.block_until_ready((y1, y2))

    r1, r2 = reference_forward(x, params)
    # Tolerance accounts for the approx (EUP) reciprocal (~2^-12 relative).
    assert jnp.allclose(y1, r1, atol=5e-3, rtol=5e-3), float(jnp.max(jnp.abs(y1 - r1)))
    assert jnp.allclose(y2, r2, atol=5e-3, rtol=5e-3), float(jnp.max(jnp.abs(y2 - r2)))

    print("KERNEL_OK")
</pallas_src>

<mosaic_0001>
module attributes {stable_mosaic.version = 11 : i64} {
  func.func @_generator_kernel(%arg0: i32, %arg1: memref<256x128xf32, #tpu.memory_space<vmem>>, %arg2: memref<128x128xbf16, #tpu.memory_space<vmem>>, %arg3: memref<1x128xf32, #tpu.memory_space<vmem>>, %arg4: memref<128x128xbf16, #tpu.memory_space<vmem>>, %arg5: memref<1x128xf32, #tpu.memory_space<vmem>>, %arg6: memref<128x128xbf16, #tpu.memory_space<vmem>>, %arg7: memref<1x128xf32, #tpu.memory_space<vmem>>, %arg8: memref<128x256xbf16, #tpu.memory_space<vmem>>, %arg9: memref<1x256xf32, #tpu.memory_space<vmem>>, %arg10: memref<256x256xf32, #tpu.memory_space<vmem>>) attributes {dimension_semantics = [#tpu.dimension_semantics<parallel>], iteration_bounds = array<i64: 2>, scalar_prefetch = 0 : i64, scratch_operands = 0 : i64, tpu.core_type = #tpu.core_type<tc>, window_params = [{transform_indices = @transform_0, window_bounds = array<i64: 256, 128>}, {pipeline_mode = #tpu.pipeline_mode<synchronous>, transform_indices = @transform_1, window_bounds = array<i64: 128, 128>}, {pipeline_mode = #tpu.pipeline_mode<synchronous>, transform_indices = @transform_2, window_bounds = array<i64: 1, 128>}, {pipeline_mode = #tpu.pipeline_mode<synchronous>, transform_indices = @transform_3, window_bounds = array<i64: 128, 128>}, {pipeline_mode = #tpu.pipeline_mode<synchronous>, transform_indices = @transform_4, window_bounds = array<i64: 1, 128>}, {pipeline_mode = #tpu.pipeline_mode<synchronous>, transform_indices = @transform_5, window_bounds = array<i64: 128, 128>}, {pipeline_mode = #tpu.pipeline_mode<synchronous>, transform_indices = @transform_6, window_bounds = array<i64: 1, 128>}, {pipeline_mode = #tpu.pipeline_mode<synchronous>, transform_indices = @transform_7, window_bounds = array<i64: 128, 256>}, {pipeline_mode = #tpu.pipeline_mode<synchronous>, transform_indices = @transform_8, window_bounds = array<i64: 1, 256>}, {transform_indices = @transform_9, window_bounds = array<i64: 256, 256>}]} {
    %c0 = arith.constant 0 : index
    %c0_0 = arith.constant 0 : index
    %0 = vector.load %arg1[%c0, %c0_0] : memref<256x128xf32, #tpu.memory_space<vmem>>, vector<256x128xf32>
    %1 = arith.truncf %0 : vector<256x128xf32> to vector<256x128xbf16>
    %c0_1 = arith.constant 0 : index
    %c0_2 = arith.constant 0 : index
    %2 = vector.load %arg2[%c0_1, %c0_2] : memref<128x128xbf16, #tpu.memory_space<vmem>>, vector<128x128xbf16>
    %cst = arith.constant dense<0.000000e+00> : vector<256x128xf32>
    %3 = tpu.matmul %1, %2, %cst {dimension_numbers = #tpu.dot_dimension_numbers<[1], [0], [0], [1], [0, 0, 1, 1], [], []>} : vector<256x128xbf16>, vector<128x128xbf16>, vector<256x128xf32> -> vector<256x128xf32>
    %c0_3 = arith.constant 0 : index
    %c0_4 = arith.constant 0 : index
    %4 = vector.load %arg3[%c0_3, %c0_4] : memref<1x128xf32, #tpu.memory_space<vmem>>, vector<1x128xf32>
    %5 = vector.broadcast %4 : vector<1x128xf32> to vector<256x128xf32>
    %6 = arith.addf %3, %5 : vector<256x128xf32>
    %cst_5 = arith.constant 0.000000e+00 : f32
    %7 = vector.broadcast %cst_5 : f32 to vector<256x128xf32>
    %8 = arith.maximumf %6, %7 : vector<256x128xf32>
    %9 = arith.truncf %8 : vector<256x128xf32> to vector<256x128xbf16>
    %c0_6 = arith.constant 0 : index
    %c0_7 = arith.constant 0 : index
    %10 = vector.load %arg4[%c0_6, %c0_7] : memref<128x128xbf16, #tpu.memory_space<vmem>>, vector<128x128xbf16>
    %cst_8 = arith.constant dense<0.000000e+00> : vector<256x128xf32>
    %11 = tpu.matmul %9, %10, %cst_8 {dimension_numbers = #tpu.dot_dimension_numbers<[1], [0], [0], [1], [0, 0, 1, 1], [], []>} : vector<256x128xbf16>, vector<128x128xbf16>, vector<256x128xf32> -> vector<256x128xf32>
    %c0_9 = arith.constant 0 : index
    %c0_10 = arith.constant 0 : index
    %12 = vector.load %arg5[%c0_9, %c0_10] : memref<1x128xf32, #tpu.memory_space<vmem>>, vector<1x128xf32>
    %13 = vector.broadcast %12 : vector<1x128xf32> to vector<256x128xf32>
    %14 = arith.addf %11, %13 : vector<256x128xf32>
    %cst_11 = arith.constant 0.000000e+00 : f32
    %15 = vector.broadcast %cst_11 : f32 to vector<256x128xf32>
    %16 = arith.maximumf %14, %15 : vector<256x128xf32>
    %17 = arith.truncf %16 : vector<256x128xf32> to vector<256x128xbf16>
    %c0_12 = arith.constant 0 : index
    %c0_13 = arith.constant 0 : index
    %18 = vector.load %arg6[%c0_12, %c0_13] : memref<128x128xbf16, #tpu.memory_space<vmem>>, vector<128x128xbf16>
    %cst_14 = arith.constant dense<0.000000e+00> : vector<256x128xf32>
    %19 = tpu.matmul %17, %18, %cst_14 {dimension_numbers = #tpu.dot_dimension_numbers<[1], [0], [0], [1], [0, 0, 1, 1], [], []>} : vector<256x128xbf16>, vector<128x128xbf16>, vector<256x128xf32> -> vector<256x128xf32>
    %c0_15 = arith.constant 0 : index
    %c0_16 = arith.constant 0 : index
    %20 = vector.load %arg7[%c0_15, %c0_16] : memref<1x128xf32, #tpu.memory_space<vmem>>, vector<1x128xf32>
    %21 = vector.broadcast %20 : vector<1x128xf32> to vector<256x128xf32>
    %22 = arith.addf %19, %21 : vector<256x128xf32>
    %cst_17 = arith.constant 0.000000e+00 : f32
    %23 = vector.broadcast %cst_17 : f32 to vector<256x128xf32>
    %24 = arith.maximumf %22, %23 : vector<256x128xf32>
    %25 = arith.truncf %24 : vector<256x128xf32> to vector<256x128xbf16>
    %c0_18 = arith.constant 0 : index
    %c0_19 = arith.constant 0 : index
    %26 = vector.load %arg8[%c0_18, %c0_19] : memref<128x256xbf16, #tpu.memory_space<vmem>>, vector<128x256xbf16>
    %cst_20 = arith.constant dense<0.000000e+00> : vector<256x256xf32>
    %27 = tpu.matmul %25, %26, %cst_20 {dimension_numbers = #tpu.dot_dimension_numbers<[1], [0], [0], [1], [0, 0, 1, 1], [], []>} : vector<256x128xbf16>, vector<128x256xbf16>, vector<256x256xf32> -> vector<256x256xf32>
    %c0_21 = arith.constant 0 : index
    %c0_22 = arith.constant 0 : index
    %28 = vector.load %arg9[%c0_21, %c0_22] : memref<1x256xf32, #tpu.memory_space<vmem>>, vector<1x256xf32>
    %29 = vector.broadcast %28 : vector<1x256xf32> to vector<256x256xf32>
    %30 = arith.addf %27, %29 : vector<256x256xf32>
    %cst_23 = arith.constant 0.000000e+00 : f32
    %31 = vector.broadcast %cst_23 : f32 to vector<256x256xf32>
    %32 = arith.maximumf %30, %31 : vector<256x256xf32>
    %33 = vector.extract_strided_slice %32 {offsets = [0, 0], sizes = [256, 128], strides = [1, 1]} : vector<256x256xf32> to vector<256x128xf32>
    %34 = vector.extract_strided_slice %32 {offsets = [0, 128], sizes = [256, 128], strides = [1, 1]} : vector<256x256xf32> to vector<256x128xf32>
    %35 = arith.addf %33, %34 : vector<256x128xf32>
    %cst_24 = arith.constant 9.99999993E-9 : f32
    %36 = vector.broadcast %cst_24 : f32 to vector<256x128xf32>
    %37 = arith.addf %35, %36 : vector<256x128xf32>
    %38 = tpu.reciprocal %37 {approx = true} : vector<256x128xf32> -> vector<256x128xf32>
    %39 = arith.mulf %38, %0 : vector<256x128xf32>
    %40 = tpu.concatenate %39, %39 in 1 : vector<256x128xf32>, vector<256x128xf32> -> vector<256x256xf32>
    %41 = arith.mulf %32, %40 : vector<256x256xf32>
    %c0_25 = arith.constant 0 : index
    %c0_26 = arith.constant 0 : index
    %42 = vector.load %arg10[%c0_25, %c0_26] : memref<256x256xf32, #tpu.memory_space<vmem>>, vector<256x256xf32>
    tpu.vector_store %arg10[%c0_25, %c0_26], %41 {strides = array<i32>} : memref<256x256xf32, #tpu.memory_space<vmem>>, vector<256x256xf32>,
    return
  }
  func.func @transform_0(%arg0: i32) -> (i32, i32) {
    %c0_i32 = arith.constant 0 : i32
    %c0_i32_0 = arith.constant 0 : i32
    return %arg0, %c0_i32 : i32, i32
  }
  func.func @transform_1(%arg0: i32) -> (i32, i32) {
    %c0_i32 = arith.constant 0 : i32
    %c0_i32_0 = arith.constant 0 : i32
    %c0_i32_1 = arith.constant 0 : i32
    return %c0_i32, %c0_i32_0 : i32, i32
  }
  func.func @transform_2(%arg0: i32) -> (i32, i32) {
    %c0_i32 = arith.constant 0 : i32
    %c0_i32_0 = arith.constant 0 : i32
    %c0_i32_1 = arith.constant 0 : i32
    return %c0_i32, %c0_i32_0 : i32, i32
  }
  func.func @transform_3(%arg0: i32) -> (i32, i32) {
    %c0_i32 = arith.constant 0 : i32
    %c0_i32_0 = arith.constant 0 : i32
    %c0_i32_1 = arith.constant 0 : i32
    return %c0_i32, %c0_i32_0 : i32, i32
  }
  func.func @transform_4(%arg0: i32) -> (i32, i32) {
    %c0_i32 = arith.constant 0 : i32
    %c0_i32_0 = arith.constant 0 : i32
    %c0_i32_1 = arith.constant 0 : i32
    return %c0_i32, %c0_i32_0 : i32, i32
  }
  func.func @transform_5(%arg0: i32) -> (i32, i32) {
    %c0_i32 = arith.constant 0 : i32
    %c0_i32_0 = arith.constant 0 : i32
    %c0_i32_1 = arith.constant 0 : i32
    return %c0_i32, %c0_i32_0 : i32, i32
  }
  func.func @transform_6(%arg0: i32) -> (i32, i32) {
    %c0_i32 = arith.constant 0 : i32
    %c0_i32_0 = arith.constant 0 : i32
    %c0_i32_1 = arith.constant 0 : i32
    return %c0_i32, %c0_i32_0 : i32, i32
  }
  func.func @transform_7(%arg0: i32) -> (i32, i32) {
    %c0_i32 = arith.constant 0 : i32
    %c0_i32_0 = arith.constant 0 : i32
    %c0_i32_1 = arith.constant 0 : i32
    return %c0_i32, %c0_i32_0 : i32, i32
  }
  func.func @transform_8(%arg0: i32) -> (i32, i32) {
    %c0_i32 = arith.constant 0 : i32
    %c0_i32_0 = arith.constant 0 : i32
    %c0_i32_1 = arith.constant 0 : i32
    return %c0_i32, %c0_i32_0 : i32, i32
  }
  func.func @transform_9(%arg0: i32) -> (i32, i32) {
    %c0_i32 = arith.constant 0 : i32
    %c0_i32_0 = arith.constant 0 : i32
    return %arg0, %c0_i32 : i32, i32
  }
}

</mosaic_0001>

<bundles_post_ra>
// kernel: tpu_custom_call.1
= control target key start
LH: loop header
LB: loop body
LE: loop exit
PB: predicated region body
PF: predicated region fallthrough
CT: control target
= control target key end

     0   :  { %s3870_s0 = inlined_call_operand.hbm [shape: f32[512,128], index: 0, kind: input, shape index: {}]   ;;  %s3871_s1 = inlined_call_operand.hbm [shape: bf16[128,128], index: 1, kind: input, shape index: {}]   ;;  %s3872_s2 = inlined_call_operand.vmem [shape: f32[1,128], index: 2, kind: input, shape index: {}]   ;;  %s3873_s3 = inlined_call_operand.hbm [shape: bf16[128,128], index: 3, kind: input, shape index: {}]   ;;  %s3874_s4 = inlined_call_operand.vmem [shape: f32[1,128], index: 4, kind: input, shape index: {}]   ;;  %s3875_s5 = inlined_call_operand.hbm [shape: bf16[128,128], index: 5, kind: input, shape index: {}]   ;;  %s3876_s6 = inlined_call_operand.vmem [shape: f32[1,128], index: 6, kind: input, shape index: {}]   ;;  %s3877_s7 = inlined_call_operand.hbm [shape: bf16[128,256], index: 7, kind: input, shape index: {}]   ;;  %s3878_s8 = inlined_call_operand.vmem [shape: f32[1,256], index: 8, kind: input, shape index: {}]   ;;  %s3879_s9 = inlined_call_operand.hbm [shape: f32[512,256], index: 9, kind: output, shape index: {}]  }
   0x1   :  { %3886 = sst [smem:[#allocation18_spill]] %s3879_s9 }
   0x2   :  { %14 = vsyncpa [#allocation3], 0 }
   0x3   :  { %16 = vsyncpa [#allocation3 + $0x1], 0 }
   0x4   :  { %17 = vsyncpa [#allocation6], 0 }
   0x5   :  { %18 = vsyncpa [#allocation9], 0 }
   0x6   :  { %19 = vsyncpa [#allocation4], 0 }
   0x7   :  { %21 = vsyncpa [#allocation4 + $0x1], 0  ;;  %s2867_s30 = smov 0   ;;  %s2869_s10 = smov 0  }
   0x8   :  { %s2871_s11 = smov 0   ;;  %s2873_s12 = smov 0  }
   0x9 LB: > { %3887 = sst [smem:[#allocation16_spill]] %s2790_s30  ;;  %s2888_s13 = sadd.s32 4294967295, %s2802_s12   ;;  %s2802_s12 = sphi %s2873_s12, %s3911_s12   ;;  %s2798_s11 = sphi %s2871_s11, %s3910_s11   ;;  %s2794_s10 = sphi %s2869_s10, %s3909_s10   ;;  %s2790_s30 = sphi %s2867_s30, %s3908_s30  }
   0xa   : > { %s2047_s14 = sadd.s32 4294967294, %s2802_s12   ;;  %p47_p0 = scmp.ne.s32.totalorder %s2794_s10, %s2790_s30 }
   0xb   : > { %p3880_p1 = scmp.eq.s32.totalorder %s2888_s13, 0  ;;  %p245_p3 = scmp.eq.s32.totalorder %s2047_s14, 1 }
   0xc   : > { %p2048_p5 = scmp.ge.s32.totalorder %s2802_s12, 1  ;;  %p252_p7 = scmp.lt.s32.totalorder %s2802_s12, 3 }
   0xd   : > { %p2897_p4 = por %p3880_p1, %p47_p0  ;;  %p2902_p6 = por %p245_p3, %p47_p0 }
   0xe   : > { %p2907_p8 = pnand %p2048_p5, %p252_p7  ;;  %s2804_s18 = smov [#allocation5]  }
   0xf   : > { %s3888_s15 = scalar_select %p2897_p4, 1, 0 }
  0x10   : > { %s3889_s16 = scalar_select %p2902_p6, 1, 0 }
  0x11   : > { %s3891_s17 = scalar_select %p2907_p8, 1, 0 }
  0x12   : > { %3890 = sst [smem:[#allocation17_spill]] %s3889_s16  ;;  %s264_s19 = sshll.u32 %s2804_s18, 4  ;;  %s2911_s19 = int_to_ptr.vmem [resolvable:$true] %s264_s19 }
  0x13   : > { %p2368_p9 = pneg %p2907_p8  ;;  %s2805_s21 = smov [#allocation8]  }
  0x14   : > { %s296_s22 = sshll.u32 %s2805_s21, 4  ;;  %s2806_s23 = smov [#allocation7]   ;;  %s2922_s22 = int_to_ptr.vmem [resolvable:$true] %s296_s22 }
  0x15   : > { %p2918_p11 = pnand %p2368_p9, %p3880_p1  ;;  %s2924_s24 = sshll.u32 %s2806_s23, 4  ;;  %s281_s24 = int_to_ptr.vmem [resolvable:$true] %s2924_s24 }
  0x16   : > { %s2586_s27 = scalar_lea.hbm %s3871_s1, 1024 }
  0x17   : > { %p2587_p12 = scmp.ne.s32.totalorder %s3871_s1, %s2586_s27  ;;  %p2934_p13 = pneg %p2918_p11 }
  0x18   : > { %p2593_p5 = scmp.lt.u32.totalorder %s2586_s27, %s3871_s1 }
  0x19   : > { %p2589_p0 = pnand %p2934_p13, %p2587_p12 }
  0x1b   : > { %p2590_p3 = pneg %p2589_p0 }
  0x1d   : > { %p2595_p7 = pnand %p2593_p5, %p2590_p3 }
  0x1f   : > { %2598 = shalt.err (!%p2595_p7)
}
  0x20   : > { %s2599_s23 = scalar_lea.vmem %s2911_s19, 1024  ;;  %p2607_p2 = scmp.lt.s32.totalorder %s2911_s19, %s2911_s19 }
  0x21   : > { %p2600_p9 = scmp.ne.s32.totalorder %s2911_s19, %s2599_s23  ;;  %p2608_p6 = scmp.lt.s32.totalorder %s2599_s23, %s2599_s23 }
  0x23   : > { %p2602_p10 = pnand %p2600_p9, %p2934_p13  ;;  %p2609_p12 = por %p2608_p6, %p2607_p2 }
  0x25   : > { %p2603_p1 = pneg %p2602_p10 }
  0x27   : > { %p2610_p0 = pnand %p2609_p12, %p2603_p1 }
  0x29   : > { %2613 = shalt.err (!%p2610_p0)
}
  0x2a   : > { %s2807_s25 = smov 64   ;;  %s2808_s26 = smov 4  }
  0x2b   : > { %2371 = dma.hbm_to_vmem [thread:$0]  (!%p2918_p11), %s3871_s1, 1024, %s2911_s19, [#allocation6], %s2807_s25, %s2807_s25, %s2808_s26  }
  0x2c   : > { %s2614_s21 = scalar_lea.hbm %s3875_s5, 1024 }
  0x2d   : > { %p2615_p1 = scmp.ne.s32.totalorder %s3875_s5, %s2614_s21  ;;  %p2621_p10 = scmp.lt.u32.totalorder %s2614_s21, %s3875_s5 }
  0x2f   : > { %p2617_p2 = pnand %p2615_p1, %p2934_p13 }
  0x31   : > { %p2618_p6 = pneg %p2617_p2 }
  0x33   : > { %p2623_p3 = pnand %p2621_p10, %p2618_p6 }
  0x35   : > { %2626 = shalt.err (!%p2623_p3)
}
  0x36   : > { %s2627_s19 = scalar_lea.vmem %s2922_s22, 1024  ;;  %p2635_p12 = scmp.lt.s32.totalorder %s2922_s22, %s2922_s22 }
  0x37   : > { %p2628_p5 = scmp.ne.s32.totalorder %s2922_s22, %s2627_s19  ;;  %p2636_p0 = scmp.lt.s32.totalorder %s2627_s19, %s2627_s19 }
  0x39   : > { %p2630_p7 = pnand %p2628_p5, %p2934_p13  ;;  %p2637_p1 = por %p2636_p0, %p2635_p12 }
  0x3b   : > { %p2631_p9 = pneg %p2630_p7 }
  0x3d   : > { %p2638_p2 = pnand %p2637_p1, %p2631_p9 }
  0x3f   : > { %2641 = shalt.err (!%p2638_p2)
}
  0x40   : > { %2377 = dma.hbm_to_vmem [thread:$0]  (!%p2918_p11), %s3875_s5, 1024, %s2922_s22, [#allocation9], %s2807_s25, %s2807_s25, %s2808_s26  }
  0x41   : > { %s2642_s28 = scalar_lea.hbm %s3873_s3, 1024 }
  0x42   : > { %p2643_p6 = scmp.ne.s32.totalorder %s3873_s3, %s2642_s28  ;;  %p2649_p5 = scmp.lt.u32.totalorder %s2642_s28, %s3873_s3 }
  0x44   : > { %p2645_p10 = pnand %p2643_p6, %p2934_p13 }
  0x46   : > { %p2646_p3 = pneg %p2645_p10 }
  0x48   : > { %p2651_p7 = pnand %p2649_p5, %p2646_p3 }
  0x4a   : > { %2654 = shalt.err (!%p2651_p7)
}
  0x4b   : > { %s2655_s19 = scalar_lea.vmem %s281_s24, 1024  ;;  %p2663_p1 = scmp.lt.s32.totalorder %s281_s24, %s281_s24 }
  0x4c   : > { %p2656_p9 = scmp.ne.s32.totalorder %s281_s24, %s2655_s19  ;;  %p2664_p2 = scmp.lt.s32.totalorder %s2655_s19, %s2655_s19 }
  0x4e   : > { %p2658_p12 = pnand %p2656_p9, %p2934_p13  ;;  %p2665_p4 = por %p2664_p2, %p2663_p1 }
  0x50   : > { %p2659_p0 = pneg %p2658_p12 }
  0x52   : > { %p2666_p8 = pnand %p2665_p4, %p2659_p0 }
  0x54   : > { %2669 = shalt.err (!%p2666_p8)
}
  0x55   : > { %2374 = dma.hbm_to_vmem [thread:$0]  (!%p2918_p11), %s3873_s3, 1024, %s281_s24, [#allocation6], %s2807_s25, %s2807_s25, %s2808_s26  }
  0x56   : > { %s2809_s30 = smov [#allocation10]   ;;  %s2670_s29 = scalar_lea.hbm %s3877_s7, 2048 }
  0x57   : > { %s312_s16 = sshll.u32 %s2809_s30, 4  ;;  %p2671_p4 = scmp.ne.s32.totalorder %s3877_s7, %s2670_s29  ;;  %s313_s16 = int_to_ptr.vmem [resolvable:$true] %s312_s16 }
  0x58   : > { %p2677_p10 = scmp.lt.u32.totalorder %s2670_s29, %s3877_s7 }
  0x59   : > { %p2673_p8 = pnand %p2671_p4, %p2934_p13 }
  0x5b   : > { %p2674_p6 = pneg %p2673_p8 }
  0x5d   : > { %p2679_p3 = pnand %p2677_p10, %p2674_p6 }
  0x5f   : > { %2682 = shalt.err (!%p2679_p3)
}
  0x60   : > { %s2683_s24 = scalar_lea.vmem %s313_s16, 2048  ;;  %p2691_p12 = scmp.lt.s32.totalorder %s313_s16, %s313_s16 }
  0x61   : > { %p2684_p5 = scmp.ne.s32.totalorder %s313_s16, %s2683_s24  ;;  %p2692_p0 = scmp.lt.s32.totalorder %s2683_s24, %s2683_s24 }
  0x63   : > { %p2686_p7 = pnand %p2684_p5, %p2934_p13  ;;  %p2693_p1 = por %p2692_p0, %p2691_p12 }
  0x65   : > { %p2687_p9 = pneg %p2686_p7 }
  0x67   : > { %p2694_p2 = pnand %p2693_p1, %p2687_p9 }
  0x69   : > { %2697 = shalt.err (!%p2694_p2)
}
  0x6a   : > { %s2810_s25 = smov 128   ;;  %s2811_s14 = smov 8  }
  0x6b   : > { %2380 = dma.hbm_to_vmem [thread:$0]  (!%p2918_p11), %s3877_s7, 2048, %s313_s16, [#allocation9], %s2810_s25, %s2810_s25, %s2811_s14  }
  0x6c   : > { %s3028_s9 = sadd.s32 1, %s2802_s12   ;;  %s34_s27 = sadd.s32 1, %s2798_s11 }
  0x6d   : > { %s31_s30 = ssub.s32 %s2802_s12, %s3028_s9  ;;  %p41_p4 = scmp.ne.s32.totalorder %s2798_s11, %s2794_s10 }
  0x6e   : > { %p32_p13 = scmp.eq.s32.totalorder %s31_s30, 0  ;;  %p42_p8 = scmp.eq.s32.totalorder %s2802_s12, 0 }
  0x6f   : > { %p3894_p10 = scmp.eq.s32.totalorder %s2888_s13, 1  ;;  %p2393_p5 = scmp.lt.s32.totalorder %s2802_s12, 2 }
  0x70   : > { %s3037_s28 = scalar_select %p32_p13, %s2798_s11, %s34_s27  }
  0x71   : > { %p43_p6 = por %p42_p8, %p41_p4  ;;  %p3041_p3 = por %p3894_p10, %p41_p4 }
  0x72   : > { %s329_s29 = sand.u32 1, %s2798_s11   ;;  %s2113_s16 = sshll.u32 %s2802_s12, 12 }
  0x73   : > { %s2054_s18 = sshll.u32 %s329_s29, 8  ;;  %s3051_s19 = scalar_lea.hbm %s3870_s0, %s2113_s16 }
  0x74   : > { %s333_s24 = scalar_lea.vmem [#allocation2], %s2054_s18  ;;  %p3055_p11 = pnand %p2393_p5, %p43_p6 }
  0x75   : > { %s340_s26 = sshll.u32 %s333_s24, 4  ;;  %s3059_s30 = scalar_lea.sflag [#allocation3], %s329_s29  ;;  %s3053_s26 = int_to_ptr.vmem [resolvable:$true] %s340_s26 }
  0x76   : > { %s2698_s27 = scalar_lea.hbm %s3051_s19, 4096  ;;  %p2700_p9 = pneg %p3055_p11 }
  0x77   : > { %p2699_p7 = scmp.ne.s32.totalorder %s3051_s19, %s2698_s27  ;;  %s2703_s21 = scalar_lea.hbm %s3870_s0, 8192 }
  0x78   : > { %p2704_p1 = scmp.lt.u32.totalorder %s3051_s19, %s3870_s0  ;;  %p2705_p2 = scmp.lt.u32.totalorder %s2703_s21, %s2698_s27 }
  0x79   : > { %p2701_p12 = pnand %p2700_p9, %p2699_p7  ;;  %p2707_p4 = scmp.lt.u32.totalorder %s2698_s27, %s3051_s19 }
  0x7a   : > { %p2706_p13 = por %p2705_p2, %p2704_p1 }
  0x7b   : > { %p2702_p0 = pneg %p2701_p12 }
  0x7c   : > { %p2708_p8 = por %p2707_p4, %p2706_p13 }
  0x7e   : > { %p2709_p6 = pnand %p2708_p8, %p2702_p0 }
  0x80   : > { %2712 = shalt.err (!%p2709_p6)
}
  0x81   : > { %s2713_s29 = scalar_lea.vmem %s3053_s26, 4096  ;;  %s2812_s18 = smov [#allocation2]  }
  0x82   : > { %p2714_p10 = scmp.ne.s32.totalorder %s3053_s26, %s2713_s29  ;;  %s2718_s16 = sshll.u32 %s2812_s18, 4  ;;  %s2719_s16 = int_to_ptr.vmem [resolvable:$false] %s2718_s16 }
  0x83   : > { %s2720_s23 = scalar_lea.vmem %s2719_s16, 8192  ;;  %p2721_p12 = scmp.lt.s32.totalorder %s3053_s26, %s2719_s16 }
  0x84   : > { %p2716_p5 = pnand %p2714_p10, %p2700_p9  ;;  %p2722_p1 = scmp.lt.s32.totalorder %s2720_s23, %s2713_s29 }
  0x86   : > { %p2717_p7 = pneg %p2716_p5  ;;  %p2723_p2 = por %p2722_p1, %p2721_p12 }
  0x88   : > { %p2724_p13 = pnand %p2723_p2, %p2717_p7 }
  0x8a   : > { %2727 = shalt.err (!%p2724_p13)
}
  0x8b   : > { %2384 = dma.hbm_to_vmem [thread:$0]  (!%p3055_p11), %s3051_s19, 4096, %s3053_s26, %s3059_s30, %s2810_s25, %s2810_s25, %s2811_s14  }
  0x8c   : > { %p3897_p9 = scmp.ne.s32.totalorder %s3891_s17, 0 }
  0x8d   : > { %s3093_s27 = sand.u32 (!%p3897_p9), 1, %s2794_s10   ;;  %p3898_p0 = scmp.ne.s32.totalorder (!%p3897_p9), %s3888_s15, 0 }
  0x8e   : > { %352 = sbr.rel (%p3897_p9) target bundleno = 1228 (0x4cc), region = 56  ;;  %s2058_s21 = sshll.u32 (!%p3897_p9), %s3093_s27, 8 }
  0x8f   : > { %s355_s24 = scalar_lea.sflag (!%p3897_p9), [#allocation3], %s3093_s27  ;;  %s3097_s29 = scalar_lea.vmem (!%p3897_p9), [#allocation2], %s2058_s21 }
  0x95   : > { %2773 = dma.done.wait (%p3898_p0), %s355_s24, 4096  }
  0x96   : > { %2775 = vsyncadd (%p3898_p0), %s355_s24, 4294963200  ;;  %p3899_p11 = scmp.eq.s32.totalorder %s2888_s13, 0 }
  0x98   : > { %2777 = dma.done.wait (%p3899_p11), [#allocation6], 2048   ;;  %p3900_p4 = pmov %p3899_p11 }
  0x9a   : > { %2779 = vsyncadd (%p3900_p4), [#allocation6], 4294965248  ;;  %p3901_p8 = pmov %p3900_p4 }
  0x9b   : > { %p3902_p6 = pmov %p3900_p4 }
  0x9c   : > { %2781 = dma.done.wait (%p3901_p8), [#allocation9], 3072  }
  0x9d   : > { %2783 = vsyncadd (%p3902_p6), [#allocation9], 4294964224  ;;  %v2442_v0 = vld [vmem:[#allocation5] sm:$0xff]   ;;  %v2443_v1 = vld [vmem:[#allocation5 + $0x8] sm:$0xff]   ;;  %s2063_s18 = sshll.u32 %s3093_s27, 9  ;;  %s2115_s23 = sshll.u32 %s2888_s13, 13 }
  0x9e   : > { %2188 = vmatprep.subr.bf16.mxu0 %v2442_v0  ;;  %v2444_v2 = vld [vmem:[#allocation5 + $0x10] sm:$0xff]   ;;  %v2445_v3 = vld [vmem:[#allocation5 + $0x18] sm:$0xff]   ;;  %v412_v4 = vld [vmem:[%s3097_s29] sm:$0xff]  ;;  %s3333_s16 = scalar_lea.vmem [#allocation11], %s2063_s18  ;;  %s3903_s17 = sld [smem:[#allocation18_spill]] }
  0x9f   : > { %2189 = vmatpush3.bf16.msra.mxu0 %v2442_v0  ;;  %v413_v5 = vld [vmem:[%s3097_s29 + $0x8] sm:$0xff]  ;;  %v2446_v7 = vld [vmem:[#allocation5 + $0x20] sm:$0xff]   ;;  %v2448_v10 = vld [vmem:[#allocation5 + $0x30] sm:$0xff]   ;;  %s1936_s21 = sshll.u32 %s3333_s16, 4  ;;  %s1922_s13 = scalar_lea.sflag [#allocation4], %s3093_s27  ;;  %s3822_s21 = int_to_ptr.vmem [resolvable:$true] %s1936_s21 }
  0xa0   : > { %2190 = vmatprep.subr.bf16.mxu0 %v2443_v1  ;;  %v444_v6 = vpack.c.bf16 %v413_v5, %v412_v4  ;;  %v2447_v8 = vld [vmem:[#allocation5 + $0x28] sm:$0xff]   ;;  %v2450_v9 = vld [vmem:[#allocation7] sm:$0xff]   ;;  %v2449_v12 = vld [vmem:[#allocation5 + $0x38] sm:$0xff]   ;;  %s2728_s14 = scalar_lea.vmem %s3822_s21, 8192 }
  0xa1   : > { %v2451_v11 = vld [vmem:[#allocation7 + $0x8] sm:$0xff]   ;;  %2332 = vmatprep.subr.bf16.mxu1 %v2450_v9  ;;  %v414_v13 = vld [vmem:[%s3097_s29 + $0x10] sm:$0xff]  ;;  %v415_v14 = vld [vmem:[%s3097_s29 + $0x18] sm:$0xff]  ;;  %p2729_p10 = scmp.ne.s32.totalorder %s3822_s21, %s2728_s14 }
  0xa2   : > { %2204 = vmatprep.mubr.bf16.mxu0 %v444_v6  ;;  %2340 = vmatpush3.bf16.msra.mxu1 %v2450_v9  ;;  %v2452_v15 = vld [vmem:[#allocation7 + $0x10] sm:$0xff]   ;;  %v416_v16 = vld [vmem:[%s3097_s29 + $0x20] sm:$0xff]  ;;  %v417_v17 = vld [vmem:[%s3097_s29 + $0x28] sm:$0xff]  ;;  %v445_v19 = vpack.c.bf16 %v415_v14, %v414_v13 }
  0xa3   : > { %2191 = vmatpush3.bf16.msra.mxu0 %v2443_v1  ;;  %2333 = vmatprep.subr.bf16.mxu1 %v2451_v11  ;;  %v2453_v18 = vld [vmem:[#allocation7 + $0x18] sm:$0xff]   ;;  %v446_v20 = vpack.c.bf16 %v417_v17, %v416_v16  ;;  %v2454_v21 = vld [vmem:[#allocation7 + $0x20] sm:$0xff]   ;;  %v418_v22 = vld [vmem:[%s3097_s29 + $0x30] sm:$0xff]  ;;  %p2730_p5 = pnand %p2729_p10, %p3041_p3 }
  0xa4   : > { %2192 = vmatprep.subr.bf16.mxu0 %v2444_v2  ;;  %v419_v23 = vld [vmem:[%s3097_s29 + $0x38] sm:$0xff]  ;;  %v420_v24 = vld [vmem:[%s3097_s29 + $0x40] sm:$0xff]  ;;  %v421_v25 = vld [vmem:[%s3097_s29 + $0x48] sm:$0xff]  ;;  %s3820_s25 = scalar_lea.hbm %s3903_s17, %s2115_s23 }
  0xa5   : > { %v2455_v26 = vld [vmem:[#allocation7 + $0x28] sm:$0xff]   ;;  %v447_v27 = vpack.c.bf16 %v419_v23, %v418_v22  ;;  %v448_v28 = vpack.c.bf16 %v421_v25, %v420_v24  ;;  %v2456_v29 = vld [vmem:[#allocation7 + $0x30] sm:$0xff]   ;;  %v423_v31 = vld [vmem:[%s3097_s29 + $0x58] sm:$0xff]  ;;  %p2731_p7 = pneg %p2730_p5 }
  0xa6   : > { %2341 = vmatpush3.bf16.msra.mxu1 %v2451_v11  ;;  %v422_v30 = vld [vmem:[%s3097_s29 + $0x50] sm:$0xff]  ;;  %v424_v32 = vld [vmem:[%s3097_s29 + $0x60] sm:$0xff]  ;;  %v425_v33 = vld [vmem:[%s3097_s29 + $0x68] sm:$0xff] }
  0xa7   : > { %2193 = vmatpush3.bf16.msra.mxu0 %v2444_v2  ;;  %2334 = vmatprep.subr.bf16.mxu1 %v2452_v15  ;;  %v449_v34 = vpack.c.bf16 %v423_v31, %v422_v30  ;;  %v450_v35 = vpack.c.bf16 %v425_v33, %v424_v32  ;;  %v426_v36 = vld [vmem:[%s3097_s29 + $0x70] sm:$0xff]  ;;  %v427_v37 = vld [vmem:[%s3097_s29 + $0x78] sm:$0xff]  ;;  %v428_v38 = vld [vmem:[%s3097_s29 + $0x80] sm:$0xff] }
  0xa8   : > { %2194 = vmatprep.subr.bf16.mxu0 %v2445_v3  ;;  %v429_v39 = vld [vmem:[%s3097_s29 + $0x88] sm:$0xff]  ;;  %v451_v40 = vpack.c.bf16 %v427_v37, %v426_v36  ;;  %v430_v42 = vld [vmem:[%s3097_s29 + $0x90] sm:$0xff]  ;;  %v431_v43 = vld [vmem:[%s3097_s29 + $0x98] sm:$0xff] }
  0xa9   : > { %v452_v41 = vpack.c.bf16 %v429_v39, %v428_v38  ;;  %v432_v44 = vld [vmem:[%s3097_s29 + $0xa0] sm:$0xff]  ;;  %v433_v45 = vld [vmem:[%s3097_s29 + $0xa8] sm:$0xff]  ;;  %v453_v46 = vpack.c.bf16 %v431_v43, %v430_v42  ;;  %v434_v48 = vld [vmem:[%s3097_s29 + $0xb0] sm:$0xff] }
  0xaa   : > { %2342 = vmatpush3.bf16.msra.mxu1 %v2452_v15  ;;  %v454_v47 = vpack.c.bf16 %v433_v45, %v432_v44  ;;  %v435_v49 = vld [vmem:[%s3097_s29 + $0xb8] sm:$0xff]  ;;  %v436_v50 = vld [vmem:[%s3097_s29 + $0xc0] sm:$0xff]  ;;  %v437_v51 = vld [vmem:[%s3097_s29 + $0xc8] sm:$0xff] }
  0xab   : > { %2195 = vmatpush3.bf16.msra.mxu0 %v2445_v3  ;;  %2335 = vmatprep.subr.bf16.mxu1 %v2453_v18  ;;  %v455_v52 = vpack.c.bf16 %v435_v49, %v434_v48  ;;  %v456_v53 = vpack.c.bf16 %v437_v51, %v436_v50  ;;  %v438_v54 = vld [vmem:[%s3097_s29 + $0xd0] sm:$0xff]  ;;  %v439_v55 = vld [vmem:[%s3097_s29 + $0xd8] sm:$0xff]  ;;  %v440_v56 = vld [vmem:[%s3097_s29 + $0xe0] sm:$0xff] }
  0xac   : > { %2196 = vmatprep.subr.bf16.mxu0 %v2446_v7  ;;  %v441_v57 = vld [vmem:[%s3097_s29 + $0xe8] sm:$0xff]  ;;  %v457_v58 = vpack.c.bf16 %v439_v55, %v438_v54  ;;  %v442_v60 = vld [vmem:[%s3097_s29 + $0xf0] sm:$0xff]  ;;  %v443_v61 = vld [vmem:[%s3097_s29 + $0xf8] sm:$0xff] }
  0xad   : > { %v458_v59 = vpack.c.bf16 %v441_v57, %v440_v56  ;;  %v459_v62 = vpack.c.bf16 %v443_v61, %v442_v60  ;;  %v2457_v63 = vld [vmem:[#allocation7 + $0x38] sm:$0xff]   ;;  %v2458_v0 = vld [vmem:[#allocation8] sm:$0xff]   ;;  %v2463_v51 = vld [vmem:[#allocation8 + $0x28] sm:$0xff]  }
  0xae   : > { %2343 = vmatpush3.bf16.msra.mxu1 %v2453_v18  ;;  %v3146_v1 = vld [vmem:[%s3872_s2] ss:$0 sm:$0xff] }
  0xaf   : > { %2197 = vmatpush3.bf16.msra.mxu0 %v2446_v7  ;;  %2336 = vmatprep.subr.bf16.mxu1 %v2454_v21  ;;  %v2462_v44 = vld [vmem:[#allocation8 + $0x20] sm:$0xff]  }
  0xb0   : > { %2198 = vmatprep.subr.bf16.mxu0 %v2447_v8 }
  0xb2   : > { %2344 = vmatpush3.bf16.msra.mxu1 %v2454_v21 }
  0xb3   : > { %2199 = vmatpush3.bf16.msra.mxu0 %v2447_v8  ;;  %2337 = vmatprep.subr.bf16.mxu1 %v2455_v26 }
  0xb4   : > { %2200 = vmatprep.subr.bf16.mxu0 %v2448_v10 }
  0xb6   : > { %2345 = vmatpush3.bf16.msra.mxu1 %v2455_v26 }
  0xb7   : > { %2201 = vmatpush3.bf16.msra.mxu0 %v2448_v10  ;;  %2338 = vmatprep.subr.bf16.mxu1 %v2456_v29 }
  0xb8   : > { %2202 = vmatprep.subr.bf16.mxu0 %v2449_v12 }
  0xba   : > { %2346 = vmatpush3.bf16.msra.mxu1 %v2456_v29 }
  0xbb   : > { %2203 = vmatpush3.bf16.msra.mxu0 %v2449_v12  ;;  %2339 = vmatprep.subr.bf16.mxu1 %v2457_v63 }
  0xbc   : > { %2236 = vmatprep.subr.bf16.mxu0 %v2450_v9 }
  0xbe   : > { %2205 = vmatmul.mubr.bf16.vlgmr.msra.gmra.mrb[0].mxu0 %v445_v19  ;;  %2347 = vmatpush3.bf16.msra.mxu1 %v2457_v63  ;;  %v2459_v19 = vld [vmem:[#allocation8 + $0x8] sm:$0xff]  }
  0xbf   : > { %2208 = vmatprep.mubr.bf16.mxu0 %v446_v20  ;;  %2237 = vmatpush3.bf16.msra.mxu0 %v2450_v9 }
  0xc0   : > { %2238 = vmatprep.subr.bf16.mxu0 %v2451_v11 }
  0xc3   : > { %2239 = vmatpush3.bf16.msra.mxu0 %v2451_v11 }
  0xc4   : > { %2240 = vmatprep.subr.bf16.mxu0 %v2452_v15 }
  0xc6   : > { %2209 = vmatmul.mubr.bf16.gmra.mrb[4].mxu0 %v447_v27 }
  0xc7   : > { %2212 = vmatprep.mubr.bf16.mxu0 %v448_v28  ;;  %2241 = vmatpush3.bf16.msra.mxu0 %v2452_v15  ;;  %v2460_v28 = vld [vmem:[#allocation8 + $0x10] sm:$0xff]  }
  0xc8   : > { %2242 = vmatprep.subr.bf16.mxu0 %v2453_v18 }
  0xcb   : > { %2243 = vmatpush3.bf16.msra.mxu0 %v2453_v18 }
  0xcc   : > { %2244 = vmatprep.subr.bf16.mxu0 %v2454_v21 }
  0xce   : > { %2213 = vmatmul.mubr.bf16.gmra.mrb[8].mxu0 %v449_v34 }
  0xcf   : > { %2216 = vmatprep.mubr.bf16.mxu0 %v450_v35  ;;  %2245 = vmatpush3.bf16.msra.mxu0 %v2454_v21  ;;  %v2461_v35 = vld [vmem:[#allocation8 + $0x18] sm:$0xff]  }
  0xd0   : > { %2246 = vmatprep.subr.bf16.mxu0 %v2455_v26 }
  0xd3   : > { %2247 = vmatpush3.bf16.msra.mxu0 %v2455_v26 }
  0xd4   : > { %2248 = vmatprep.subr.bf16.mxu0 %v2456_v29 }
  0xd6   : > { %2217 = vmatmul.mubr.bf16.gmra.mrb[12].mxu0 %v451_v40 }
  0xd7   : > { %2220 = vmatprep.mubr.bf16.mxu0 %v452_v41  ;;  %2249 = vmatpush3.bf16.msra.mxu0 %v2456_v29 }
  0xd8   : > { %2250 = vmatprep.subr.bf16.mxu0 %v2457_v63 }
  0xdb   : > { %2251 = vmatpush3.bf16.msra.mxu0 %v2457_v63 }
  0xdc   : > { %2284 = vmatprep.subr.bf16.mxu0 %v2458_v0 }
  0xde   : > { %2221 = vmatmul.mubr.bf16.gmra.mrb[16].mxu0 %v453_v46 }
  0xdf   : > { %2224 = vmatprep.mubr.bf16.mxu0 %v454_v47 }
  0xe6   : > { %2225 = vmatmul.mubr.bf16.gmra.mrb[20].mxu0 %v455_v52 }
  0xe7   : > { %2228 = vmatprep.mubr.bf16.mxu0 %v456_v53 }
  0xee   : > { %2229 = vmatmul.mubr.bf16.gmra.mrb[24].mxu0 %v457_v58 }
  0xef   : > { %2232 = vmatprep.mubr.bf16.mxu0 %v458_v59 }
  0xf6   : > { %2233 = vmatmul.mubr.bf16.gmra.mrb[28].mxu0 %v459_v62 }
 0x191   : > { %v2206_v2 = vpop.f32.mrb[0].mxu0 }
 0x192   : > { %v574_v3 = vadd.f32 %v2206_v2, %v3146_v1  ;;  %v565_v4 = vpop.f32.mrb[1].mxu0 }
 0x193   : > { %v566_v5 = vadd.f32 %v3146_v1, %v565_v4  ;;  %v2207_v6 = vpop.f32.mrb[2].mxu0 }
 0x194   : > { %v577_v7 = vadd.f32 %v2207_v6, %v3146_v1  ;;  %v568_v8 = vpop.f32.mrb[3].mxu0  ;;  %v694_v10 = vmax.f32 %v574_v3, 0.0 }
 0x195   : > { %v569_v9 = vadd.f32 %v3146_v1, %v568_v8  ;;  %v692_v12 = vmax.f32 %v566_v5, 0.0 }
 0x196   : > { %v695_v11 = vmax.f32 %v577_v7, 0.0 }
 0x197   : > { %v693_v13 = vmax.f32 %v569_v9, 0.0 }
 0x198   : > { %v725_v14 = vpack.c.bf16 %v695_v11, %v694_v10 }
 0x199   : > { %v724_v15 = vpack.c.bf16 %v693_v13, %v692_v12  ;;  %v2210_v16 = vpop.f32.mrb[4].mxu0 }
 0x19a   : > { %v590_v17 = vadd.f32 %v2210_v16, %v3146_v1  ;;  %v581_v18 = vpop.f32.mrb[5].mxu0 }
 0x19b   : > { %v582_v20 = vadd.f32 %v3146_v1, %v581_v18  ;;  %v2211_v21 = vpop.f32.mrb[6].mxu0  ;;  %2252 = vmatprep.mubr.bf16.mxu0 %v724_v15 }
 0x19c   : > { %v698_v22 = vmax.f32 %v590_v17, 0.0  ;;  %v593_v23 = vadd.f32 %v2211_v21, %v3146_v1  ;;  %v584_v24 = vpop.f32.mrb[7].mxu0  ;;  %2253 = vmatmul.mubr.bf16.vlgmr.msra.gmra.mrb[32].mxu0 %v725_v14 }
 0x19d   : > { %v696_v25 = vmax.f32 %v582_v20, 0.0  ;;  %v585_v26 = vadd.f32 %v3146_v1, %v584_v24  ;;  %2285 = vmatpush3.bf16.msra.mxu0 %v2458_v0 }
 0x19e   : > { %v699_v27 = vmax.f32 %v593_v23, 0.0  ;;  %2286 = vmatprep.subr.bf16.mxu0 %v2459_v19 }
 0x19f   : > { %v697_v29 = vmax.f32 %v585_v26, 0.0 }
 0x1a0   : > { %v727_v30 = vpack.c.bf16 %v699_v27, %v698_v22 }
 0x1a1   : > { %v726_v31 = vpack.c.bf16 %v697_v29, %v696_v25  ;;  %v2214_v32 = vpop.f32.mrb[8].mxu0  ;;  %2287 = vmatpush3.bf16.msra.mxu0 %v2459_v19 }
 0x1a2   : > { %v606_v33 = vadd.f32 %v2214_v32, %v3146_v1  ;;  %v597_v34 = vpop.f32.mrb[9].mxu0  ;;  %2288 = vmatprep.subr.bf16.mxu0 %v2460_v28 }
 0x1a3   : > { %2256 = vmatprep.mubr.bf16.mxu0 %v726_v31  ;;  %v598_v36 = vadd.f32 %v3146_v1, %v597_v34  ;;  %v2215_v37 = vpop.f32.mrb[10].mxu0 }
 0x1a4   : > { %2257 = vmatmul.mubr.bf16.gmra.mrb[36].mxu0 %v727_v30  ;;  %v702_v38 = vmax.f32 %v606_v33, 0.0  ;;  %v609_v39 = vadd.f32 %v2215_v37, %v3146_v1  ;;  %v600_v40 = vpop.f32.mrb[11].mxu0 }
 0x1a5   : > { %v700_v41 = vmax.f32 %v598_v36, 0.0  ;;  %v601_v42 = vadd.f32 %v3146_v1, %v600_v40  ;;  %2289 = vmatpush3.bf16.msra.mxu0 %v2460_v28 }
 0x1a6   : > { %v703_v43 = vmax.f32 %v609_v39, 0.0  ;;  %2290 = vmatprep.subr.bf16.mxu0 %v2461_v35 }
 0x1a7   : > { %v701_v45 = vmax.f32 %v601_v42, 0.0 }
 0x1a8   : > { %v729_v46 = vpack.c.bf16 %v703_v43, %v702_v38 }
 0x1a9   : > { %v728_v47 = vpack.c.bf16 %v701_v45, %v700_v41  ;;  %v2218_v48 = vpop.f32.mrb[12].mxu0  ;;  %2291 = vmatpush3.bf16.msra.mxu0 %v2461_v35 }
 0x1aa   : > { %v622_v49 = vadd.f32 %v2218_v48, %v3146_v1  ;;  %v613_v50 = vpop.f32.mrb[13].mxu0  ;;  %2292 = vmatprep.subr.bf16.mxu0 %v2462_v44 }
 0x1ab   : > { %2260 = vmatprep.mubr.bf16.mxu0 %v728_v47  ;;  %v614_v52 = vadd.f32 %v3146_v1, %v613_v50  ;;  %v2219_v53 = vpop.f32.mrb[14].mxu0 }
 0x1ac   : > { %2261 = vmatmul.mubr.bf16.gmra.mrb[40].mxu0 %v729_v46  ;;  %v706_v54 = vmax.f32 %v622_v49, 0.0  ;;  %v625_v55 = vadd.f32 %v2219_v53, %v3146_v1  ;;  %v616_v56 = vpop.f32.mrb[15].mxu0 }
 0x1ad   : > { %v704_v57 = vmax.f32 %v614_v52, 0.0  ;;  %v617_v58 = vadd.f32 %v3146_v1, %v616_v56  ;;  %2293 = vmatpush3.bf16.msra.mxu0 %v2462_v44  ;;  %v2464_v56 = vld [vmem:[#allocation8 + $0x30] sm:$0xff]  }
 0x1ae   : > { %v707_v59 = vmax.f32 %v625_v55, 0.0  ;;  %2294 = vmatprep.subr.bf16.mxu0 %v2463_v51 }
 0x1af   : > { %v705_v60 = vmax.f32 %v617_v58, 0.0  ;;  %v2466_v58 = vld [vmem:[#allocation10] ss:$8 sps:$4 sm:$0xff]  }
 0x1b0   : > { %v731_v61 = vpack.c.bf16 %v707_v59, %v706_v54  ;;  %v2468_v59 = vld [vmem:[#allocation10 + $0x4] ss:$8 sps:$4 sm:$0xff]  }
 0x1b1   : > { %v730_v62 = vpack.c.bf16 %v705_v60, %v704_v57  ;;  %v2222_v63 = vpop.f32.mrb[16].mxu0  ;;  %2295 = vmatpush3.bf16.msra.mxu0 %v2463_v51  ;;  %v2465_v57 = vld [vmem:[#allocation8 + $0x38] sm:$0xff]   ;;  %1408 = vmatprep.subr.bf16.mxu1 %v2468_v59 }
 0x1b2   : > { %v638_v0 = vadd.f32 %v2222_v63, %v3146_v1  ;;  %v629_v2 = vpop.f32.mrb[17].mxu0  ;;  %2296 = vmatprep.subr.bf16.mxu0 %v2464_v56  ;;  %v2471_v60 = vld [vmem:[#allocation10 + $0x14] ss:$8 sps:$4 sm:$0xff]  }
 0x1b3   : > { %2264 = vmatprep.mubr.bf16.mxu0 %v730_v62  ;;  %v630_v3 = vadd.f32 %v3146_v1, %v629_v2  ;;  %v2223_v4 = vpop.f32.mrb[18].mxu0  ;;  %v2472_v62 = vld [vmem:[#allocation10 + $0x20] ss:$8 sps:$4 sm:$0xff]   ;;  %v2477_v63 = vld [vmem:[#allocation10 + $0x34] ss:$8 sps:$4 sm:$0xff]  }
 0x1b4   : > { %2265 = vmatmul.mubr.bf16.gmra.mrb[44].mxu0 %v731_v61  ;;  %v710_v5 = vmax.f32 %v638_v0, 0.0  ;;  %v641_v6 = vadd.f32 %v2223_v4, %v3146_v1  ;;  %v632_v7 = vpop.f32.mrb[19].mxu0  ;;  %v2469_v61 = vld [vmem:[#allocation10 + $0x10] ss:$8 sps:$4 sm:$0xff]   ;;  %v2480_v2 = vld [vmem:[#allocation10 + $0x44] ss:$8 sps:$4 sm:$0xff]  }
 0x1b5   : > { %v708_v8 = vmax.f32 %v630_v3, 0.0  ;;  %v633_v9 = vadd.f32 %v3146_v1, %v632_v7  ;;  %2297 = vmatpush3.bf16.msra.mxu0 %v2464_v56  ;;  %v2475_v0 = vld [vmem:[#allocation10 + $0x30] ss:$8 sps:$4 sm:$0xff]   ;;  %v2478_v3 = vld [vmem:[#allocation10 + $0x40] ss:$8 sps:$4 sm:$0xff]  }
 0x1b6   : > { %v711_v10 = vmax.f32 %v641_v6, 0.0  ;;  %2298 = vmatprep.subr.bf16.mxu0 %v2465_v57  ;;  %v2483_v4 = vld [vmem:[#allocation10 + $0x54] ss:$8 sps:$4 sm:$0xff]   ;;  %v3183_v6 = vld [vmem:[%s3874_s4] ss:$0 sm:$0xff] }
 0x1b7   : > { %v709_v11 = vmax.f32 %v633_v9, 0.0 }
 0x1b8   : > { %v733_v12 = vpack.c.bf16 %v711_v10, %v710_v5  ;;  %v2481_v5 = vld [vmem:[#allocation10 + $0x50] ss:$8 sps:$4 sm:$0xff]  }
 0x1b9   : > { %v732_v13 = vpack.c.bf16 %v709_v11, %v708_v8  ;;  %v2226_v14 = vpop.f32.mrb[20].mxu0  ;;  %2299 = vmatpush3.bf16.msra.mxu0 %v2465_v57 }
 0x1ba   : > { %v654_v15 = vadd.f32 %v2226_v14, %v3146_v1  ;;  %v645_v16 = vpop.f32.mrb[21].mxu0 }
 0x1bb   : > { %2268 = vmatprep.mubr.bf16.mxu1 %v732_v13  ;;  %v646_v17 = vadd.f32 %v3146_v1, %v645_v16  ;;  %v2227_v18 = vpop.f32.mrb[22].mxu0 }
 0x1bc   : > { %2269 = vmatmul.mubr.bf16.vlgmr.msra.gmra.mrb[0].mxu1 %v733_v12  ;;  %v714_v19 = vmax.f32 %v654_v15, 0.0  ;;  %v657_v20 = vadd.f32 %v2227_v18, %v3146_v1  ;;  %v648_v21 = vpop.f32.mrb[23].mxu0 }
 0x1bd   : > { %v712_v22 = vmax.f32 %v646_v17, 0.0  ;;  %v649_v23 = vadd.f32 %v3146_v1, %v648_v21  ;;  %1409 = vmatpush1.bf16.msra.mxu1 %v2466_v58 }
 0x1be   : > { %v715_v24 = vmax.f32 %v657_v20, 0.0  ;;  %1410 = vmatprep.subr.bf16.mxu1 %v2471_v60 }
 0x1bf   : > { %v713_v25 = vmax.f32 %v649_v23, 0.0 }
 0x1c0   : > { %v735_v26 = vpack.c.bf16 %v715_v24, %v714_v19 }
 0x1c1   : > { %v734_v27 = vpack.c.bf16 %v713_v25, %v712_v22  ;;  %v2230_v28 = vpop.f32.mrb[24].mxu0  ;;  %1411 = vmatpush1.bf16.msra.mxu1 %v2469_v61 }
 0x1c2   : > { %v670_v29 = vadd.f32 %v2230_v28, %v3146_v1  ;;  %v661_v30 = vpop.f32.mrb[25].mxu0 }
 0x1c3   : > { %2272 = vmatprep.mubr.bf16.mxu1 %v734_v27  ;;  %v662_v31 = vadd.f32 %v3146_v1, %v661_v30  ;;  %v2231_v32 = vpop.f32.mrb[26].mxu0 }
 0x1c4   : > { %2273 = vmatmul.mubr.bf16.gmra.mrb[4].mxu1 %v735_v26  ;;  %v718_v33 = vmax.f32 %v670_v29, 0.0  ;;  %v673_v34 = vadd.f32 %v2231_v32, %v3146_v1  ;;  %v664_v35 = vpop.f32.mrb[27].mxu0 }
 0x1c5   : > { %v716_v36 = vmax.f32 %v662_v31, 0.0  ;;  %v665_v37 = vadd.f32 %v3146_v1, %v664_v35 }
 0x1c6   : > { %v719_v38 = vmax.f32 %v673_v34, 0.0 }
 0x1c7   : > { %v717_v39 = vmax.f32 %v665_v37, 0.0 }
 0x1c8   : > { %v737_v40 = vpack.c.bf16 %v719_v38, %v718_v33 }
 0x1c9   : > { %v736_v41 = vpack.c.bf16 %v717_v39, %v716_v36  ;;  %v2234_v42 = vpop.f32.mrb[28].mxu0 }
 0x1ca   : > { %v686_v43 = vadd.f32 %v2234_v42, %v3146_v1  ;;  %v677_v44 = vpop.f32.mrb[29].mxu0 }
 0x1cb   : > { %2276 = vmatprep.mubr.bf16.mxu1 %v736_v41  ;;  %v678_v45 = vadd.f32 %v3146_v1, %v677_v44  ;;  %v2235_v46 = vpop.f32.mrb[30].mxu0 }
 0x1cc   : > { %2277 = vmatmul.mubr.bf16.gmra.mrb[8].mxu1 %v737_v40  ;;  %v722_v47 = vmax.f32 %v686_v43, 0.0  ;;  %v689_v48 = vadd.f32 %v2235_v46, %v3146_v1  ;;  %v680_v49 = vpop.f32.mrb[31].mxu0 }
 0x1cd   : > { %v720_v50 = vmax.f32 %v678_v45, 0.0  ;;  %v681_v51 = vadd.f32 %v3146_v1, %v680_v49  ;;  %v2474_v1 = vld [vmem:[#allocation10 + $0x24] ss:$8 sps:$4 sm:$0xff]  }
 0x1ce   : > { %v723_v52 = vmax.f32 %v689_v48, 0.0  ;;  %1412 = vmatprep.subr.bf16.mxu1 %v2474_v1 }
 0x1cf   : > { %v721_v53 = vmax.f32 %v681_v51, 0.0  ;;  %1413 = vmatpush1.bf16.msra.mxu1 %v2472_v62 }
 0x1d0   : > { %v739_v54 = vpack.c.bf16 %v723_v52, %v722_v47  ;;  %1414 = vmatprep.subr.bf16.mxu1 %v2477_v63 }
 0x1d1   : > { %v738_v55 = vpack.c.bf16 %v721_v53, %v720_v50 }
 0x1d3   : > { %2280 = vmatprep.mubr.bf16.mxu1 %v738_v55  ;;  %1415 = vmatpush1.bf16.msra.mxu1 %v2475_v0 }
 0x1d4   : > { %2281 = vmatmul.mubr.bf16.gmra.mrb[12].mxu1 %v739_v54  ;;  %1416 = vmatprep.subr.bf16.mxu1 %v2480_v2 }
 0x1d7   : > { %1417 = vmatpush1.bf16.msra.mxu1 %v2478_v3 }
 0x1d8   : > { %1418 = vmatprep.subr.bf16.mxu1 %v2483_v4 }
 0x1db   : > { %1419 = vmatpush1.bf16.msra.mxu1 %v2481_v5 }
 0x26f   : > { %v2254_v7 = vpop.f32.mrb[32].mxu0 }
 0x270   : > { %v854_v8 = vadd.f32 %v2254_v7, %v3183_v6  ;;  %v845_v9 = vpop.f32.mrb[33].mxu0 }
 0x271   : > { %v846_v10 = vadd.f32 %v3183_v6, %v845_v9  ;;  %v2255_v11 = vpop.f32.mrb[34].mxu0 }
 0x272   : > { %v857_v12 = vadd.f32 %v2255_v11, %v3183_v6  ;;  %v848_v13 = vpop.f32.mrb[35].mxu0  ;;  %v974_v15 = vmax.f32 %v854_v8, 0.0 }
 0x273   : > { %v849_v14 = vadd.f32 %v3183_v6, %v848_v13  ;;  %v972_v17 = vmax.f32 %v846_v10, 0.0 }
 0x274   : > { %v975_v16 = vmax.f32 %v857_v12, 0.0 }
 0x275   : > { %v973_v18 = vmax.f32 %v849_v14, 0.0 }
 0x276   : > { %v1005_v19 = vpack.c.bf16 %v975_v16, %v974_v15 }
 0x277   : > { %v1004_v20 = vpack.c.bf16 %v973_v18, %v972_v17  ;;  %v2258_v21 = vpop.f32.mrb[36].mxu0 }
 0x278   : > { %v870_v22 = vadd.f32 %v2258_v21, %v3183_v6  ;;  %v861_v23 = vpop.f32.mrb[37].mxu0 }
 0x279   : > { %v862_v24 = vadd.f32 %v3183_v6, %v861_v23  ;;  %v2259_v25 = vpop.f32.mrb[38].mxu0  ;;  %2300 = vmatprep.mubr.bf16.mxu0 %v1004_v20 }
 0x27a   : > { %v978_v26 = vmax.f32 %v870_v22, 0.0  ;;  %v873_v27 = vadd.f32 %v2259_v25, %v3183_v6  ;;  %v864_v28 = vpop.f32.mrb[39].mxu0  ;;  %2301 = vmatmul.mubr.bf16.vlgmr.msra.gmra.mrb[48].mxu0 %v1005_v19 }
 0x27b   : > { %v976_v29 = vmax.f32 %v862_v24, 0.0  ;;  %v865_v30 = vadd.f32 %v3183_v6, %v864_v28 }
 0x27c   : > { %v979_v31 = vmax.f32 %v873_v27, 0.0 }
 0x27d   : > { %v977_v32 = vmax.f32 %v865_v30, 0.0 }
 0x27e   : > { %v1007_v33 = vpack.c.bf16 %v979_v31, %v978_v26 }
 0x27f   : > { %v1006_v34 = vpack.c.bf16 %v977_v32, %v976_v29  ;;  %v2262_v35 = vpop.f32.mrb[40].mxu0 }
 0x280   : > { %v886_v36 = vadd.f32 %v2262_v35, %v3183_v6  ;;  %v877_v37 = vpop.f32.mrb[41].mxu0 }
 0x281   : > { %2304 = vmatprep.mubr.bf16.mxu0 %v1006_v34  ;;  %v878_v38 = vadd.f32 %v3183_v6, %v877_v37  ;;  %v2263_v39 = vpop.f32.mrb[42].mxu0 }
 0x282   : > { %2305 = vmatmul.mubr.bf16.gmra.mrb[52].mxu0 %v1007_v33  ;;  %v982_v40 = vmax.f32 %v886_v36, 0.0  ;;  %v889_v41 = vadd.f32 %v2263_v39, %v3183_v6  ;;  %v880_v42 = vpop.f32.mrb[43].mxu0 }
 0x283   : > { %v980_v43 = vmax.f32 %v878_v38, 0.0  ;;  %v881_v44 = vadd.f32 %v3183_v6, %v880_v42 }
 0x284   : > { %v983_v45 = vmax.f32 %v889_v41, 0.0 }
 0x285   : > { %v981_v46 = vmax.f32 %v881_v44, 0.0 }
 0x286   : > { %v1009_v47 = vpack.c.bf16 %v983_v45, %v982_v40 }
 0x287   : > { %v1008_v48 = vpack.c.bf16 %v981_v46, %v980_v43  ;;  %v2266_v49 = vpop.f32.mrb[44].mxu0 }
 0x288   : > { %v902_v50 = vadd.f32 %v2266_v49, %v3183_v6  ;;  %v893_v51 = vpop.f32.mrb[45].mxu0 }
 0x289   : > { %2308 = vmatprep.mubr.bf16.mxu0 %v1008_v48  ;;  %v894_v52 = vadd.f32 %v3183_v6, %v893_v51  ;;  %v2267_v53 = vpop.f32.mrb[46].mxu0 }
 0x28a   : > { %2309 = vmatmul.mubr.bf16.gmra.mrb[56].mxu0 %v1009_v47  ;;  %v986_v54 = vmax.f32 %v902_v50, 0.0  ;;  %v905_v55 = vadd.f32 %v2267_v53, %v3183_v6  ;;  %v896_v56 = vpop.f32.mrb[47].mxu0 }
 0x28b   : > { %v984_v57 = vmax.f32 %v894_v52, 0.0  ;;  %v897_v58 = vadd.f32 %v3183_v6, %v896_v56  ;;  %v2486_v56 = vld [vmem:[#allocation10 + $0x64] ss:$8 sps:$4 sm:$0xff]  }
 0x28c   : > { %v987_v59 = vmax.f32 %v905_v55, 0.0  ;;  %1420 = vmatprep.subr.bf16.mxu1 %v2486_v56 }
 0x28d   : > { %v985_v60 = vmax.f32 %v897_v58, 0.0  ;;  %v2489_v58 = vld [vmem:[#allocation10 + $0x74] ss:$8 sps:$4 sm:$0xff]  }
 0x28e   : > { %v1011_v61 = vpack.c.bf16 %v987_v59, %v986_v54  ;;  %v2487_v59 = vld [vmem:[#allocation10 + $0x70] ss:$8 sps:$4 sm:$0xff]  }
 0x28f   : > { %v1010_v1 = vpack.c.bf16 %v985_v60, %v984_v57  ;;  %v2270_v62 = vpop.f32.mrb[0].mxu1  ;;  %v2484_v57 = vld [vmem:[#allocation10 + $0x60] ss:$8 sps:$4 sm:$0xff]   ;;  %v2813_v60 = vmov 0  }
 0x290   : > { %v918_v63 = vadd.f32 %v2270_v62, %v3183_v6  ;;  %v909_v0 = vpop.f32.mrb[1].mxu1  ;;  %1421 = vmatpush1.bf16.msra.mxu1 %v2484_v57  ;;  %1440 = vmatprep.mubr.bf16.mxu1 %v2813_v60 }
 0x291   : > { %2312 = vmatprep.mubr.bf16.mxu0 %v1010_v1  ;;  %v910_v2 = vadd.f32 %v3183_v6, %v909_v0  ;;  %v2271_v3 = vpop.f32.mrb[2].mxu1  ;;  %1422 = vmatprep.subr.bf16.mxu1 %v2489_v58 }
 0x292   : > { %2313 = vmatmul.mubr.bf16.gmra.mrb[60].mxu0 %v1011_v61  ;;  %v990_v4 = vmax.f32 %v918_v63, 0.0  ;;  %v921_v5 = vadd.f32 %v2271_v3, %v3183_v6  ;;  %v912_v7 = vpop.f32.mrb[3].mxu1 }
 0x293   : > { %v988_v8 = vmax.f32 %v910_v2, 0.0  ;;  %v913_v9 = vadd.f32 %v3183_v6, %v912_v7 }
 0x294   : > { %v991_v10 = vmax.f32 %v921_v5, 0.0  ;;  %1423 = vmatpush1.bf16.msra.mxu1 %v2487_v59 }
 0x295   : > { %v989_v11 = vmax.f32 %v913_v9, 0.0 }
 0x296   : > { %v1013_v12 = vpack.c.bf16 %v991_v10, %v990_v4 }
 0x297   : > { %v1012_v13 = vpack.c.bf16 %v989_v11, %v988_v8  ;;  %v2274_v14 = vpop.f32.mrb[4].mxu1 }
 0x298   : > { %v934_v15 = vadd.f32 %v2274_v14, %v3183_v6  ;;  %v925_v16 = vpop.f32.mrb[5].mxu1 }
 0x299   : > { %2316 = vmatprep.mubr.bf16.mxu0 %v1012_v13  ;;  %v926_v17 = vadd.f32 %v3183_v6, %v925_v16  ;;  %v2275_v18 = vpop.f32.mrb[6].mxu1 }
 0x29a   : > { %2317 = vmatmul.mubr.bf16.gmra.mrb[64].mxu0 %v1013_v12  ;;  %v994_v19 = vmax.f32 %v934_v15, 0.0  ;;  %v937_v20 = vadd.f32 %v2275_v18, %v3183_v6  ;;  %v928_v21 = vpop.f32.mrb[7].mxu1 }
 0x29b   : > { %v992_v22 = vmax.f32 %v926_v17, 0.0  ;;  %v929_v23 = vadd.f32 %v3183_v6, %v928_v21 }
 0x29c   : > { %v995_v24 = vmax.f32 %v937_v20, 0.0 }
 0x29d   : > { %v993_v25 = vmax.f32 %v929_v23, 0.0 }
 0x29e   : > { %v1015_v26 = vpack.c.bf16 %v995_v24, %v994_v19 }
 0x29f   : > { %v1014_v27 = vpack.c.bf16 %v993_v25, %v992_v22  ;;  %v2278_v28 = vpop.f32.mrb[8].mxu1 }
 0x2a0   : > { %v950_v29 = vadd.f32 %v2278_v28, %v3183_v6  ;;  %v941_v30 = vpop.f32.mrb[9].mxu1 }
 0x2a1   : > { %2320 = vmatprep.mubr.bf16.mxu0 %v1014_v27  ;;  %v942_v31 = vadd.f32 %v3183_v6, %v941_v30  ;;  %v2279_v32 = vpop.f32.mrb[10].mxu1 }
 0x2a2   : > { %2321 = vmatmul.mubr.bf16.gmra.mrb[68].mxu0 %v1015_v26  ;;  %v998_v33 = vmax.f32 %v950_v29, 0.0  ;;  %v953_v34 = vadd.f32 %v2279_v32, %v3183_v6  ;;  %v944_v35 = vpop.f32.mrb[11].mxu1 }
 0x2a3   : > { %v996_v36 = vmax.f32 %v942_v31, 0.0  ;;  %v945_v37 = vadd.f32 %v3183_v6, %v944_v35 }
 0x2a4   : > { %v999_v38 = vmax.f32 %v953_v34, 0.0 }
 0x2a5   : > { %v997_v39 = vmax.f32 %v945_v37, 0.0 }
 0x2a6   : > { %v1017_v40 = vpack.c.bf16 %v999_v38, %v998_v33 }
 0x2a7   : > { %v1016_v41 = vpack.c.bf16 %v997_v39, %v996_v36  ;;  %v2282_v42 = vpop.f32.mrb[12].mxu1 }
 0x2a8   : > { %v966_v43 = vadd.f32 %v2282_v42, %v3183_v6  ;;  %v957_v44 = vpop.f32.mrb[13].mxu1 }
 0x2a9   : > { %2324 = vmatprep.mubr.bf16.mxu0 %v1016_v41  ;;  %v958_v45 = vadd.f32 %v3183_v6, %v957_v44  ;;  %v2283_v46 = vpop.f32.mrb[14].mxu1 }
 0x2aa   : > { %2325 = vmatmul.mubr.bf16.gmra.mrb[72].mxu0 %v1017_v40  ;;  %v1002_v47 = vmax.f32 %v966_v43, 0.0  ;;  %v969_v48 = vadd.f32 %v2283_v46, %v3183_v6  ;;  %v960_v49 = vpop.f32.mrb[15].mxu1 }
 0x2ab   : > { %v1000_v50 = vmax.f32 %v958_v45, 0.0  ;;  %v961_v51 = vadd.f32 %v3183_v6, %v960_v49  ;;  %v3221_v6 = vld [vmem:[%s3876_s6] ss:$0 sm:$0xff] }
 0x2ac   : > { %v1003_v52 = vmax.f32 %v969_v48, 0.0 }
 0x2ad   : > { %v1001_v53 = vmax.f32 %v961_v51, 0.0 }
 0x2ae   : > { %v1019_v54 = vpack.c.bf16 %v1003_v52, %v1002_v47 }
 0x2af   : > { %v1018_v55 = vpack.c.bf16 %v1001_v53, %v1000_v50 }
 0x2b1   : > { %2328 = vmatprep.mubr.bf16.mxu0 %v1018_v55 }
 0x2b2   : > { %2329 = vmatmul.mubr.bf16.gmra.mrb[76].mxu0 %v1019_v54 }
 0x34d   : > { %v2302_v61 = vpop.f32.mrb[48].mxu0 }
 0x34e   : > { %v1134_v1 = vadd.f32 %v2302_v61, %v3221_v6  ;;  %v1125_v62 = vpop.f32.mrb[49].mxu0 }
 0x34f   : > { %v1126_v63 = vadd.f32 %v3221_v6, %v1125_v62  ;;  %v2303_v0 = vpop.f32.mrb[50].mxu0 }
 0x350   : > { %v1137_v2 = vadd.f32 %v2303_v0, %v3221_v6  ;;  %v1128_v3 = vpop.f32.mrb[51].mxu0  ;;  %v1254_v5 = vmax.f32 %v1134_v1, 0.0 }
 0x351   : > { %v1129_v4 = vadd.f32 %v3221_v6, %v1128_v3  ;;  %v1252_v8 = vmax.f32 %v1126_v63, 0.0 }
 0x352   : > { %v1255_v7 = vmax.f32 %v1137_v2, 0.0 }
 0x353   : > { %v1253_v9 = vmax.f32 %v1129_v4, 0.0 }
 0x354   : > { %v1285_v10 = vpack.c.bf16 %v1255_v7, %v1254_v5 }
 0x355   : > { %v1284_v11 = vpack.c.bf16 %v1253_v9, %v1252_v8  ;;  %v2306_v12 = vpop.f32.mrb[52].mxu0 }
 0x356   : > { %v1150_v13 = vadd.f32 %v2306_v12, %v3221_v6  ;;  %v1141_v14 = vpop.f32.mrb[53].mxu0 }
 0x357   : > { %v1142_v15 = vadd.f32 %v3221_v6, %v1141_v14  ;;  %v2307_v16 = vpop.f32.mrb[54].mxu0  ;;  %1441 = vmatmul.mubr.bf16.vlgmr.msra.gmra.mrb[16].mxu1 %v1284_v11 }
 0x358   : > { %v1153_v17 = vadd.f32 %v2307_v16, %v3221_v6  ;;  %v1144_v18 = vpop.f32.mrb[55].mxu0  ;;  %1450 = vmatprep.mubr.bf16.mxu1 %v2813_v60  ;;  %v1258_v20 = vmax.f32 %v1150_v13, 0.0 }
 0x359   : > { %v1145_v19 = vadd.f32 %v3221_v6, %v1144_v18  ;;  %v1256_v22 = vmax.f32 %v1142_v15, 0.0 }
 0x35a   : > { %v1259_v21 = vmax.f32 %v1153_v17, 0.0 }
 0x35b   : > { %v1257_v23 = vmax.f32 %v1145_v19, 0.0 }
 0x35c   : > { %v1287_v24 = vpack.c.bf16 %v1259_v21, %v1258_v20 }
 0x35d   : > { %v1286_v25 = vpack.c.bf16 %v1257_v23, %v1256_v22  ;;  %v2310_v26 = vpop.f32.mrb[56].mxu0 }
 0x35e   : > { %v1166_v27 = vadd.f32 %v2310_v26, %v3221_v6  ;;  %v1157_v28 = vpop.f32.mrb[57].mxu0 }
 0x35f   : > { %1451 = vmatmul.mubr.bf16.gmra.mrb[20].mxu1 %v1285_v10  ;;  %v1158_v29 = vadd.f32 %v3221_v6, %v1157_v28  ;;  %v2311_v30 = vpop.f32.mrb[58].mxu0 }
 0x360   : > { %v1262_v31 = vmax.f32 %v1166_v27, 0.0  ;;  %v1169_v32 = vadd.f32 %v2311_v30, %v3221_v6  ;;  %v1160_v33 = vpop.f32.mrb[59].mxu0  ;;  %1460 = vmatprep.mubr.bf16.mxu1 %v2813_v60 }
 0x361   : > { %v1260_v34 = vmax.f32 %v1158_v29, 0.0  ;;  %v1161_v35 = vadd.f32 %v3221_v6, %v1160_v33 }
 0x362   : > { %v1263_v36 = vmax.f32 %v1169_v32, 0.0 }
 0x363   : > { %v1261_v37 = vmax.f32 %v1161_v35, 0.0 }
 0x364   : > { %v1289_v38 = vpack.c.bf16 %v1263_v36, %v1262_v31 }
 0x365   : > { %v1288_v39 = vpack.c.bf16 %v1261_v37, %v1260_v34  ;;  %v2314_v40 = vpop.f32.mrb[60].mxu0 }
 0x366   : > { %v1182_v41 = vadd.f32 %v2314_v40, %v3221_v6  ;;  %v1173_v42 = vpop.f32.mrb[61].mxu0 }
 0x367   : > { %1461 = vmatmul.mubr.bf16.gmra.mrb[24].mxu1 %v1286_v25  ;;  %v1174_v43 = vadd.f32 %v3221_v6, %v1173_v42  ;;  %v2315_v44 = vpop.f32.mrb[62].mxu0 }
 0x368   : > { %1470 = vmatprep.mubr.bf16.mxu1 %v2813_v60  ;;  %v1266_v45 = vmax.f32 %v1182_v41, 0.0  ;;  %v1185_v46 = vadd.f32 %v2315_v44, %v3221_v6  ;;  %v1176_v47 = vpop.f32.mrb[63].mxu0 }
 0x369   : > { %v1264_v48 = vmax.f32 %v1174_v43, 0.0  ;;  %v1177_v49 = vadd.f32 %v3221_v6, %v1176_v47 }
 0x36a   : > { %v1267_v50 = vmax.f32 %v1185_v46, 0.0 }
 0x36b   : > { %v1265_v51 = vmax.f32 %v1177_v49, 0.0 }
 0x36c   : > { %v3242_v52 = vpack.c.bf16 %v1267_v50, %v1266_v45  ;;  %v1316_v50 = vld [vmem:[%s3878_s8] sm:$0x3] }
 0x36d   : > { %v1290_v53 = vpack.c.bf16 %v1265_v51, %v1264_v48  ;;  %v2318_v54 = vpop.f32.mrb[64].mxu0 }
 0x36e   : > { %v1198_v55 = vadd.f32 %v2318_v54, %v3221_v6  ;;  %v1189_v56 = vpop.f32.mrb[65].mxu0 }
 0x36f   : > { %1471 = vmatmul.mubr.bf16.gmra.mrb[28].mxu1 %v1287_v24  ;;  %v1190_v57 = vadd.f32 %v3221_v6, %v1189_v56  ;;  %v2319_v58 = vpop.f32.mrb[66].mxu0 }
 0x370   : > { %1480 = vmatprep.mubr.bf16.mxu1 %v2813_v60  ;;  %v1270_v59 = vmax.f32 %v1198_v55, 0.0  ;;  %v1201_v61 = vadd.f32 %v2319_v58, %v3221_v6  ;;  %v1192_v1 = vpop.f32.mrb[67].mxu0 }
 0x371   : > { %v1268_v62 = vmax.f32 %v1190_v57, 0.0  ;;  %v1193_v63 = vadd.f32 %v3221_v6, %v1192_v1 }
 0x372   : > { %v1271_v0 = vmax.f32 %v1201_v61, 0.0 }
 0x373   : > { %v1269_v2 = vmax.f32 %v1193_v63, 0.0 }
 0x374   : > { %v1293_v3 = vpack.c.bf16 %v1271_v0, %v1270_v59 }
 0x375   : > { %v1292_v4 = vpack.c.bf16 %v1269_v2, %v1268_v62  ;;  %v2322_v5 = vpop.f32.mrb[68].mxu0 }
 0x376   : > { %v1214_v7 = vadd.f32 %v2322_v5, %v3221_v6  ;;  %v1205_v8 = vpop.f32.mrb[69].mxu0 }
 0x377   : > { %1481 = vmatmul.mubr.bf16.gmra.mrb[32].mxu1 %v1288_v39  ;;  %v1206_v9 = vadd.f32 %v3221_v6, %v1205_v8  ;;  %v2323_v10 = vpop.f32.mrb[70].mxu0 }
 0x378   : > { %1490 = vmatprep.mubr.bf16.mxu1 %v2813_v60  ;;  %v1274_v11 = vmax.f32 %v1214_v7, 0.0  ;;  %v1217_v12 = vadd.f32 %v2323_v10, %v3221_v6  ;;  %v1208_v13 = vpop.f32.mrb[71].mxu0 }
 0x379   : > { %v1272_v14 = vmax.f32 %v1206_v9, 0.0  ;;  %v1209_v15 = vadd.f32 %v3221_v6, %v1208_v13 }
 0x37a   : > { %v1275_v16 = vmax.f32 %v1217_v12, 0.0 }
 0x37b   : > { %v1273_v17 = vmax.f32 %v1209_v15, 0.0 }
 0x37c   : > { %v1295_v18 = vpack.c.bf16 %v1275_v16, %v1274_v11 }
 0x37d   : > { %v1294_v19 = vpack.c.bf16 %v1273_v17, %v1272_v14  ;;  %v2326_v20 = vpop.f32.mrb[72].mxu0 }
 0x37e   : > { %v1230_v21 = vadd.f32 %v2326_v20, %v3221_v6  ;;  %v1221_v22 = vpop.f32.mrb[73].mxu0 }
 0x37f   : > { %1491 = vmatmul.mubr.bf16.gmra.mrb[36].mxu1 %v1289_v38  ;;  %v1222_v23 = vadd.f32 %v3221_v6, %v1221_v22  ;;  %v2327_v24 = vpop.f32.mrb[74].mxu0 }
 0x380   : > { %1500 = vmatprep.mubr.bf16.mxu1 %v2813_v60  ;;  %v1278_v25 = vmax.f32 %v1230_v21, 0.0  ;;  %v1233_v26 = vadd.f32 %v2327_v24, %v3221_v6  ;;  %v1224_v27 = vpop.f32.mrb[75].mxu0 }
 0x381   : > { %v1276_v28 = vmax.f32 %v1222_v23, 0.0  ;;  %v1225_v29 = vadd.f32 %v3221_v6, %v1224_v27 }
 0x382   : > { %v1279_v30 = vmax.f32 %v1233_v26, 0.0 }
 0x383   : > { %v1277_v31 = vmax.f32 %v1225_v29, 0.0 }
 0x384   : > { %v1297_v32 = vpack.c.bf16 %v1279_v30, %v1278_v25 }
 0x385   : > { %v1296_v33 = vpack.c.bf16 %v1277_v31, %v1276_v28  ;;  %v2330_v34 = vpop.f32.mrb[76].mxu0 }
 0x386   : > { %v1246_v35 = vadd.f32 %v2330_v34, %v3221_v6  ;;  %v1237_v36 = vpop.f32.mrb[77].mxu0  ;;  %v2554_v34 = vld [vmem:[%s3097_s29] sm:$0xff] }
 0x387   : > { %1501 = vmatmul.mubr.bf16.gmra.mrb[40].mxu1 %v1290_v53  ;;  %v1238_v37 = vadd.f32 %v3221_v6, %v1237_v36  ;;  %v2331_v38 = vpop.f32.mrb[78].mxu0 }
 0x388   : > { %1510 = vmatprep.mubr.bf16.mxu1 %v2813_v60  ;;  %v1282_v39 = vmax.f32 %v1246_v35, 0.0  ;;  %v1249_v40 = vadd.f32 %v2331_v38, %v3221_v6  ;;  %v1240_v41 = vpop.f32.mrb[79].mxu0 }
 0x389   : > { %v1280_v42 = vmax.f32 %v1238_v37, 0.0  ;;  %v1241_v43 = vadd.f32 %v3221_v6, %v1240_v41  ;;  %v1318_v6 = vlaneseq }
 0x38a   : > { %v1283_v44 = vmax.f32 %v1249_v40, 0.0 }
 0x38b   : > { %v1281_v45 = vmax.f32 %v1241_v43, 0.0  ;;  %v1319_v48 = vshrl.u32 %v1318_v6, 7 }
 0x38c   : > { %v1299_v46 = vpack.c.bf16 %v1283_v44, %v1282_v39 }
 0x38d   : > { %v1298_v47 = vpack.c.bf16 %v1281_v45, %v1280_v42  ;;  %v1320_v49 = vsub.s32 0, %v1319_v48  ;;  %v1324_v51 = vsub.s32 1, %v1319_v48  ;;  %v2555_v42 = vld [vmem:[%s3097_s29 + $0x8] sm:$0xff] }
 0x38f   : > { %1511 = vmatmul.mubr.bf16.gmra.mrb[44].mxu1 %v3242_v52  ;;  %v3276_v52 = vrot.slane %v1316_v50, %v1320_v49  ;;  %v3278_v53 = vrot.slane %v1316_v50, %v1324_v51 }
 0x390   : > { %1520 = vmatprep.mubr.bf16.mxu1 %v2813_v60 }
 0x397   : > { %1521 = vmatmul.mubr.bf16.gmra.mrb[48].mxu1 %v1292_v4 }
 0x398   : > { %1530 = vmatprep.mubr.bf16.mxu1 %v2813_v60 }
 0x39f   : > { %1531 = vmatmul.mubr.bf16.gmra.mrb[52].mxu1 %v1293_v3 }
 0x3a0   : > { %1540 = vmatprep.mubr.bf16.mxu1 %v2813_v60 }
 0x3a7   : > { %1541 = vmatmul.mubr.bf16.gmra.mrb[56].mxu1 %v1294_v19 }
 0x3a8   : > { %1550 = vmatprep.mubr.bf16.mxu1 %v2813_v60 }
 0x3af   : > { %1551 = vmatmul.mubr.bf16.gmra.mrb[60].mxu1 %v1295_v18 }
 0x3b0   : > { %1560 = vmatprep.mubr.bf16.mxu1 %v2813_v60 }
 0x3b7   : > { %1561 = vmatmul.mubr.bf16.gmra.mrb[64].mxu1 %v1296_v33 }
 0x3b8   : > { %1570 = vmatprep.mubr.bf16.mxu1 %v2813_v60 }
 0x3bf   : > { %1571 = vmatmul.mubr.bf16.gmra.mrb[68].mxu1 %v1297_v32 }
 0x3c0   : > { %1580 = vmatprep.mubr.bf16.mxu1 %v2813_v60 }
 0x3c7   : > { %1581 = vmatmul.mubr.bf16.gmra.mrb[72].mxu1 %v1298_v47 }
 0x3c8   : > { %1590 = vmatprep.mubr.bf16.mxu1 %v2813_v60 }
 0x3cf   : > { %1591 = vmatmul.mubr.bf16.gmra.mrb[76].mxu1 %v1299_v46 }
 0x42a   : > { %v1442_v54 = vpop.f32.mrb[16].mxu1 }
 0x42b   : > { %v1443_v55 = vadd.f32 %v1442_v54, %v3276_v52  ;;  %v1444_v56 = vpop.f32.mrb[17].mxu1 }
 0x42c   : > { %v1445_v57 = vadd.f32 %v1444_v56, %v3278_v53  ;;  %v1446_v60 = vpop.f32.mrb[18].mxu1 }
 0x42d   : > { %v1601_v58 = vmax.f32 %v1443_v55, 0.0  ;;  %v1447_v59 = vadd.f32 %v1446_v60, %v3276_v52  ;;  %v1448_v61 = vpop.f32.mrb[19].mxu1 }
 0x42e   : > { %v1602_v1 = vmax.f32 %v1445_v57, 0.0  ;;  %v1449_v62 = vadd.f32 %v1448_v61, %v3278_v53  ;;  %v2556_v61 = vld [vmem:[%s3097_s29 + $0x10] sm:$0xff] }
 0x42f   : > { %v1603_v63 = vmax.f32 %v1447_v59, 0.0 }
 0x430   : > { %v1665_v0 = vadd.f32 %v1602_v1, %v1601_v58  ;;  %v1604_v2 = vmax.f32 %v1449_v62, 0.0 }
 0x432   : > { %v1697_v3 = vadd.f32 1e-08, %v1665_v0  ;;  %v1666_v4 = vadd.f32 %v1604_v2, %v1603_v63  ;;  %v1452_v5 = vpop.f32.mrb[20].mxu1 }
 0x433   : > { %v3285_v7 = vadd.f32 %v1452_v5, %v3276_v52  ;;  %v1454_v8 = vpop.f32.mrb[21].mxu1  ;;  %v2557_v5 = vld [vmem:[%s3097_s29 + $0x18] sm:$0xff] }
 0x434   : > { %2490 = vrcp.f32 %v1697_v3  ;;  %v1698_v9 = vadd.f32 1e-08, %v1666_v4  ;;  %v3288_v10 = vadd.f32 %v1454_v8, %v3278_v53  ;;  %v1456_v11 = vpop.f32.mrb[22].mxu1 }
 0x435   : > { %v1605_v12 = vmax.f32 %v3285_v7, 0.0  ;;  %v3292_v13 = vadd.f32 %v1456_v11, %v3276_v52  ;;  %v1458_v14 = vpop.f32.mrb[23].mxu1 }
 0x436   : > { %2492 = vrcp.f32 %v1698_v9  ;;  %v1606_v15 = vmax.f32 %v3288_v10, 0.0  ;;  %v3296_v16 = vadd.f32 %v1458_v14, %v3278_v53 }
 0x437   : > { %v1607_v17 = vmax.f32 %v3292_v13, 0.0 }
 0x438   : > { %v1667_v18 = vadd.f32 %v1606_v15, %v1605_v12  ;;  %v1608_v19 = vmax.f32 %v3296_v16, 0.0 }
 0x43a   : > { %v1699_v20 = vadd.f32 1e-08, %v1667_v18  ;;  %v1668_v21 = vadd.f32 %v1608_v19, %v1607_v17  ;;  %v1462_v22 = vpop.f32.mrb[24].mxu1 }
 0x43b   : > { %v3307_v23 = vadd.f32 %v1462_v22, %v3276_v52  ;;  %v1464_v24 = vpop.f32.mrb[25].mxu1 }
 0x43c   : > { %2494 = vrcp.f32 %v1699_v20  ;;  %v1700_v25 = vadd.f32 1e-08, %v1668_v21  ;;  %v3310_v26 = vadd.f32 %v1464_v24, %v3278_v53  ;;  %v1466_v27 = vpop.f32.mrb[26].mxu1 }
 0x43d   : > { %v1609_v28 = vmax.f32 %v3307_v23, 0.0  ;;  %v3315_v29 = vadd.f32 %v1466_v27, %v3276_v52  ;;  %v1468_v30 = vpop.f32.mrb[27].mxu1 }
 0x43e   : > { %v2491_v31 = vpop.eup %2490  ;;  %2496 = vrcp.f32 %v1700_v25  ;;  %v1610_v32 = vmax.f32 %v3310_v26, 0.0  ;;  %v3319_v33 = vadd.f32 %v1468_v30, %v3278_v53  ;;  %v2558_v25 = vld [vmem:[%s3097_s29 + $0x20] sm:$0xff] }
 0x43f   : > { %v1761_v35 = vmul.f32 %v2554_v34, %v2491_v31  ;;  %v1611_v36 = vmax.f32 %v3315_v29, 0.0 }
 0x440   : > { %v2493_v37 = vpop.eup %2492  ;;  %v1669_v38 = vadd.f32 %v1610_v32, %v1609_v28  ;;  %v1612_v39 = vmax.f32 %v3319_v33, 0.0 }
 0x441   : > { %v1793_v40 = vmul.f32 %v1761_v35, %v1601_v58  ;;  %v1794_v41 = vmul.f32 %v1761_v35, %v1602_v1  ;;  %v1762_v43 = vmul.f32 %v2555_v42, %v2493_v37 }
 0x442   : > { %v1701_v44 = vadd.f32 1e-08, %v1669_v38  ;;  %v1670_v45 = vadd.f32 %v1612_v39, %v1611_v36  ;;  %v1472_v46 = vpop.f32.mrb[28].mxu1 }
 0x443   : > { %1857 = vst [vmem:[%s3333_s16] sm:$0xff] %v1793_v40  ;;  %1858 = vst [vmem:[%s3333_s16 + $0x8] sm:$0xff] %v1794_v41  ;;  %v1795_v47 = vmul.f32 %v1762_v43, %v1603_v63  ;;  %v1796_v6 = vmul.f32 %v1762_v43, %v1604_v2  ;;  %v3338_v48 = vadd.f32 %v1472_v46, %v3276_v52  ;;  %v1474_v49 = vpop.f32.mrb[29].mxu1  ;;  %v2559_v40 = vld [vmem:[%s3097_s29 + $0x28] sm:$0xff] }
 0x444   : > { %2498 = vrcp.f32 %v1701_v44  ;;  %v1702_v50 = vadd.f32 1e-08, %v1670_v45  ;;  %v3341_v51 = vadd.f32 %v1474_v49, %v3278_v53  ;;  %v1476_v54 = vpop.f32.mrb[30].mxu1 }
 0x445   : > { %1859 = vst [vmem:[%s3333_s16 + $0x10] sm:$0xff] %v1795_v47  ;;  %1860 = vst [vmem:[%s3333_s16 + $0x18] sm:$0xff] %v1796_v6  ;;  %v1613_v55 = vmax.f32 %v3338_v48, 0.0  ;;  %v3347_v56 = vadd.f32 %v1476_v54, %v3276_v52  ;;  %v1478_v57 = vpop.f32.mrb[31].mxu1 }
 0x446   : > { %v2495_v60 = vpop.eup %2494  ;;  %2500 = vrcp.f32 %v1702_v50  ;;  %v1614_v58 = vmax.f32 %v3341_v51, 0.0  ;;  %v3351_v59 = vadd.f32 %v1478_v57, %v3278_v53  ;;  %v2560_v50 = vld [vmem:[%s3097_s29 + $0x30] sm:$0xff] }
 0x447   : > { %v1763_v1 = vmul.f32 %v2556_v61, %v2495_v60  ;;  %v1615_v62 = vmax.f32 %v3347_v56, 0.0 }
 0x448   : > { %v2497_v63 = vpop.eup %2496  ;;  %v1671_v0 = vadd.f32 %v1614_v58, %v1613_v55  ;;  %v1616_v2 = vmax.f32 %v3351_v59, 0.0 }
 0x449   : > { %v1797_v3 = vmul.f32 %v1763_v1, %v1605_v12  ;;  %v1798_v4 = vmul.f32 %v1763_v1, %v1606_v15  ;;  %v1764_v8 = vmul.f32 %v2557_v5, %v2497_v63 }
 0x44a   : > { %v1703_v9 = vadd.f32 1e-08, %v1671_v0  ;;  %v1672_v10 = vadd.f32 %v1616_v2, %v1615_v62  ;;  %v1482_v11 = vpop.f32.mrb[32].mxu1 }
 0x44b   : > { %1861 = vst [vmem:[%s3333_s16 + $0x20] sm:$0xff] %v1797_v3  ;;  %1862 = vst [vmem:[%s3333_s16 + $0x28] sm:$0xff] %v1798_v4  ;;  %v1799_v14 = vmul.f32 %v1764_v8, %v1607_v17  ;;  %v1800_v7 = vmul.f32 %v1764_v8, %v1608_v19  ;;  %v3374_v12 = vadd.f32 %v1482_v11, %v3276_v52  ;;  %v1484_v15 = vpop.f32.mrb[33].mxu1  ;;  %v2561_v3 = vld [vmem:[%s3097_s29 + $0x38] sm:$0xff] }
 0x44c   : > { %2502 = vrcp.f32 %v1703_v9  ;;  %v1704_v18 = vadd.f32 1e-08, %v1672_v10  ;;  %v3377_v20 = vadd.f32 %v1484_v15, %v3278_v53  ;;  %v1486_v21 = vpop.f32.mrb[34].mxu1 }
 0x44d   : > { %1863 = vst [vmem:[%s3333_s16 + $0x30] sm:$0xff] %v1799_v14  ;;  %1864 = vst [vmem:[%s3333_s16 + $0x38] sm:$0xff] %v1800_v7  ;;  %v1617_v13 = vmax.f32 %v3374_v12, 0.0  ;;  %v3383_v17 = vadd.f32 %v1486_v21, %v3276_v52  ;;  %v1488_v16 = vpop.f32.mrb[35].mxu1 }
 0x44e   : > { %v2499_v19 = vpop.eup %2498  ;;  %2504 = vrcp.f32 %v1704_v18  ;;  %v1618_v22 = vmax.f32 %v3377_v20, 0.0  ;;  %v3387_v24 = vadd.f32 %v1488_v16, %v3278_v53  ;;  %v2562_v18 = vld [vmem:[%s3097_s29 + $0x40] sm:$0xff] }
 0x44f   : > { %v1765_v27 = vmul.f32 %v2558_v25, %v2499_v19  ;;  %v1619_v30 = vmax.f32 %v3383_v17, 0.0 }
 0x450   : > { %v2501_v31 = vpop.eup %2500  ;;  %v1673_v34 = vadd.f32 %v1618_v22, %v1617_v13  ;;  %v1620_v35 = vmax.f32 %v3387_v24, 0.0 }
 0x451   : > { %v1801_v37 = vmul.f32 %v1765_v27, %v1609_v28  ;;  %v1802_v38 = vmul.f32 %v1765_v27, %v1610_v32  ;;  %v1766_v41 = vmul.f32 %v2559_v40, %v2501_v31 }
 0x452   : > { %v1705_v42 = vadd.f32 1e-08, %v1673_v34  ;;  %v1674_v43 = vadd.f32 %v1620_v35, %v1619_v30  ;;  %v1492_v44 = vpop.f32.mrb[36].mxu1 }
 0x453   : > { %1865 = vst [vmem:[%s3333_s16 + $0x40] sm:$0xff] %v1801_v37  ;;  %1866 = vst [vmem:[%s3333_s16 + $0x48] sm:$0xff] %v1802_v38  ;;  %v1803_v23 = vmul.f32 %v1766_v41, %v1611_v36  ;;  %v1804_v26 = vmul.f32 %v1766_v41, %v1612_v39  ;;  %v3412_v28 = vadd.f32 %v1492_v44, %v3276_v52  ;;  %v1494_v32 = vpop.f32.mrb[37].mxu1  ;;  %v2563_v37 = vld [vmem:[%s3097_s29 + $0x48] sm:$0xff] }
 0x454   : > { %2506 = vrcp.f32 %v1705_v42  ;;  %v1706_v45 = vadd.f32 1e-08, %v1674_v43  ;;  %v3415_v46 = vadd.f32 %v1494_v32, %v3278_v53  ;;  %v1496_v47 = vpop.f32.mrb[38].mxu1 }
 0x455   : > { %1867 = vst [vmem:[%s3333_s16 + $0x50] sm:$0xff] %v1803_v23  ;;  %1868 = vst [vmem:[%s3333_s16 + $0x58] sm:$0xff] %v1804_v26  ;;  %v1621_v29 = vmax.f32 %v3412_v28, 0.0  ;;  %v3421_v36 = vadd.f32 %v1496_v47, %v3276_v52  ;;  %v1498_v33 = vpop.f32.mrb[39].mxu1 }
 0x456   : > { %v2503_v39 = vpop.eup %2502  ;;  %2508 = vrcp.f32 %v1706_v45  ;;  %v1622_v6 = vmax.f32 %v3415_v46, 0.0  ;;  %v3425_v49 = vadd.f32 %v1498_v33, %v3278_v53  ;;  %v2564_v45 = vld [vmem:[%s3097_s29 + $0x50] sm:$0xff] }
 0x457   : > { %v1767_v54 = vmul.f32 %v2560_v50, %v2503_v39  ;;  %v1623_v57 = vmax.f32 %v3421_v36, 0.0 }
 0x458   : > { %v2505_v60 = vpop.eup %2504  ;;  %v1675_v61 = vadd.f32 %v1622_v6, %v1621_v29  ;;  %v1624_v1 = vmax.f32 %v3425_v49, 0.0 }
 0x459   : > { %v1805_v63 = vmul.f32 %v1767_v54, %v1613_v55  ;;  %v1806_v0 = vmul.f32 %v1767_v54, %v1614_v58  ;;  %v1768_v4 = vmul.f32 %v2561_v3, %v2505_v60 }
 0x45a   : > { %v1707_v5 = vadd.f32 1e-08, %v1675_v61  ;;  %v1676_v8 = vadd.f32 %v1624_v1, %v1623_v57  ;;  %v1502_v9 = vpop.f32.mrb[40].mxu1 }
 0x45b   : > { %1869 = vst [vmem:[%s3333_s16 + $0x60] sm:$0xff] %v1805_v63  ;;  %1870 = vst [vmem:[%s3333_s16 + $0x68] sm:$0xff] %v1806_v0  ;;  %v1807_v48 = vmul.f32 %v1768_v4, %v1615_v62  ;;  %v1808_v51 = vmul.f32 %v1768_v4, %v1616_v2  ;;  %v3450_v55 = vadd.f32 %v1502_v9, %v3276_v52  ;;  %v1504_v58 = vpop.f32.mrb[41].mxu1  ;;  %v2565_v63 = vld [vmem:[%s3097_s29 + $0x58] sm:$0xff] }
 0x45c   : > { %2510 = vrcp.f32 %v1707_v5  ;;  %v1708_v10 = vadd.f32 1e-08, %v1676_v8  ;;  %v3453_v11 = vadd.f32 %v1504_v58, %v3278_v53  ;;  %v1506_v14 = vpop.f32.mrb[42].mxu1 }
 0x45d   : > { %1871 = vst [vmem:[%s3333_s16 + $0x70] sm:$0xff] %v1807_v48  ;;  %1872 = vst [vmem:[%s3333_s16 + $0x78] sm:$0xff] %v1808_v51  ;;  %v1625_v56 = vmax.f32 %v3450_v55, 0.0  ;;  %v3459_v62 = vadd.f32 %v1506_v14, %v3276_v52  ;;  %v1508_v59 = vpop.f32.mrb[43].mxu1 }
 0x45e   : > { %v2507_v2 = vpop.eup %2506  ;;  %2512 = vrcp.f32 %v1708_v10  ;;  %v1626_v7 = vmax.f32 %v3453_v11, 0.0  ;;  %v3463_v15 = vadd.f32 %v1508_v59, %v3278_v53  ;;  %v2566_v10 = vld [vmem:[%s3097_s29 + $0x60] sm:$0xff] }
 0x45f   : > { %v1769_v21 = vmul.f32 %v2562_v18, %v2507_v2  ;;  %v1627_v16 = vmax.f32 %v3459_v62, 0.0 }
 0x460   : > { %v2509_v19 = vpop.eup %2508  ;;  %v1677_v25 = vadd.f32 %v1626_v7, %v1625_v56  ;;  %v1628_v27 = vmax.f32 %v3463_v15, 0.0 }
 0x461   : > { %v1809_v31 = vmul.f32 %v1769_v21, %v1617_v13  ;;  %v1810_v34 = vmul.f32 %v1769_v21, %v1618_v22  ;;  %v1770_v38 = vmul.f32 %v2563_v37, %v2509_v19 }
 0x462   : > { %v1709_v40 = vadd.f32 1e-08, %v1677_v25  ;;  %v1678_v41 = vadd.f32 %v1628_v27, %v1627_v16  ;;  %v1512_v42 = vpop.f32.mrb[44].mxu1 }
 0x463   : > { %1873 = vst [vmem:[%s3333_s16 + $0x80] sm:$0xff] %v1809_v31  ;;  %1874 = vst [vmem:[%s3333_s16 + $0x88] sm:$0xff] %v1810_v34  ;;  %v1811_v12 = vmul.f32 %v1770_v38, %v1619_v30  ;;  %v1812_v20 = vmul.f32 %v1770_v38, %v1620_v35  ;;  %v3488_v13 = vadd.f32 %v1512_v42, %v3276_v52  ;;  %v1514_v22 = vpop.f32.mrb[45].mxu1  ;;  %v2567_v31 = vld [vmem:[%s3097_s29 + $0x68] sm:$0xff] }
 0x464   : > { %2514 = vrcp.f32 %v1709_v40  ;;  %v1710_v43 = vadd.f32 1e-08, %v1678_v41  ;;  %v3491_v44 = vadd.f32 %v1514_v22, %v3278_v53  ;;  %v1516_v23 = vpop.f32.mrb[46].mxu1 }
 0x465   : > { %1875 = vst [vmem:[%s3333_s16 + $0x90] sm:$0xff] %v1811_v12  ;;  %1876 = vst [vmem:[%s3333_s16 + $0x98] sm:$0xff] %v1812_v20  ;;  %v1629_v17 = vmax.f32 %v3488_v13, 0.0  ;;  %v3497_v30 = vadd.f32 %v1516_v23, %v3276_v52  ;;  %v1518_v24 = vpop.f32.mrb[47].mxu1 }
 0x466   : > { %v2511_v35 = vpop.eup %2510  ;;  %2516 = vrcp.f32 %v1710_v43  ;;  %v1630_v26 = vmax.f32 %v3491_v44, 0.0  ;;  %v3501_v32 = vadd.f32 %v1518_v24, %v3278_v53  ;;  %v2568_v43 = vld [vmem:[%s3097_s29 + $0x70] sm:$0xff] }
 0x467   : > { %v1771_v47 = vmul.f32 %v2564_v45, %v2511_v35  ;;  %v1631_v33 = vmax.f32 %v3497_v30, 0.0 }
 0x468   : > { %v2513_v39 = vpop.eup %2512  ;;  %v1679_v50 = vadd.f32 %v1630_v26, %v1629_v17  ;;  %v1632_v54 = vmax.f32 %v3501_v32, 0.0 }
 0x469   : > { %v1813_v60 = vmul.f32 %v1771_v47, %v1621_v29  ;;  %v1814_v61 = vmul.f32 %v1771_v47, %v1622_v6  ;;  %v1772_v0 = vmul.f32 %v2565_v63, %v2513_v39 }
 0x46a   : > { %v1711_v3 = vadd.f32 1e-08, %v1679_v50  ;;  %v1680_v4 = vadd.f32 %v1632_v54, %v1631_v33  ;;  %v1522_v5 = vpop.f32.mrb[48].mxu1 }
 0x46b   : > { %1877 = vst [vmem:[%s3333_s16 + $0xa0] sm:$0xff] %v1813_v60  ;;  %1878 = vst [vmem:[%s3333_s16 + $0xa8] sm:$0xff] %v1814_v61  ;;  %v1815_v28 = vmul.f32 %v1772_v0, %v1623_v57  ;;  %v1816_v46 = vmul.f32 %v1772_v0, %v1624_v1  ;;  %v3526_v29 = vadd.f32 %v1522_v5, %v3276_v52  ;;  %v1524_v6 = vpop.f32.mrb[49].mxu1  ;;  %v2569_v60 = vld [vmem:[%s3097_s29 + $0x78] sm:$0xff] }
 0x46c   : > { %2518 = vrcp.f32 %v1711_v3  ;;  %v1712_v8 = vadd.f32 1e-08, %v1680_v4  ;;  %v3529_v9 = vadd.f32 %v1524_v6, %v3278_v53  ;;  %v1526_v48 = vpop.f32.mrb[50].mxu1 }
 0x46d   : > { %1879 = vst [vmem:[%s3333_s16 + $0xb0] sm:$0xff] %v1815_v28  ;;  %1880 = vst [vmem:[%s3333_s16 + $0xb8] sm:$0xff] %v1816_v46  ;;  %v1633_v36 = vmax.f32 %v3526_v29, 0.0  ;;  %v3535_v57 = vadd.f32 %v1526_v48, %v3276_v52  ;;  %v1528_v49 = vpop.f32.mrb[51].mxu1 }
 0x46e   : > { %v2515_v1 = vpop.eup %2514  ;;  %2520 = vrcp.f32 %v1712_v8  ;;  %v1634_v51 = vmax.f32 %v3529_v9, 0.0  ;;  %v3539_v58 = vadd.f32 %v1528_v49, %v3278_v53  ;;  %v2570_v8 = vld [vmem:[%s3097_s29 + $0x80] sm:$0xff] }
 0x46f   : > { %v1773_v14 = vmul.f32 %v2566_v10, %v2515_v1  ;;  %v1635_v59 = vmax.f32 %v3535_v57, 0.0 }
 0x470   : > { %v2517_v2 = vpop.eup %2516  ;;  %v1681_v18 = vadd.f32 %v1634_v51, %v1633_v36  ;;  %v1636_v21 = vmax.f32 %v3539_v58, 0.0 }
 0x471   : > { %v1817_v19 = vmul.f32 %v1773_v14, %v1625_v56  ;;  %v1818_v25 = vmul.f32 %v1773_v14, %v1626_v7  ;;  %v1774_v34 = vmul.f32 %v2567_v31, %v2517_v2 }
 0x472   : > { %v1713_v37 = vadd.f32 1e-08, %v1681_v18  ;;  %v1682_v38 = vadd.f32 %v1636_v21, %v1635_v59  ;;  %v1532_v40 = vpop.f32.mrb[52].mxu1 }
 0x473   : > { %1881 = vst [vmem:[%s3333_s16 + $0xc0] sm:$0xff] %v1817_v19  ;;  %1882 = vst [vmem:[%s3333_s16 + $0xc8] sm:$0xff] %v1818_v25  ;;  %v1819_v55 = vmul.f32 %v1774_v34, %v1627_v16  ;;  %v1820_v11 = vmul.f32 %v1774_v34, %v1628_v27  ;;  %v3564_v56 = vadd.f32 %v1532_v40, %v3276_v52  ;;  %v1534_v7 = vpop.f32.mrb[53].mxu1  ;;  %v2571_v19 = vld [vmem:[%s3097_s29 + $0x88] sm:$0xff] }
 0x474   : > { %2522 = vrcp.f32 %v1713_v37  ;;  %v1714_v41 = vadd.f32 1e-08, %v1682_v38  ;;  %v3567_v42 = vadd.f32 %v1534_v7, %v3278_v53  ;;  %v1536_v12 = vpop.f32.mrb[54].mxu1 }
 0x475   : > { %1883 = vst [vmem:[%s3333_s16 + $0xd0] sm:$0xff] %v1819_v55  ;;  %1884 = vst [vmem:[%s3333_s16 + $0xd8] sm:$0xff] %v1820_v11  ;;  %v1637_v62 = vmax.f32 %v3564_v56, 0.0  ;;  %v3573_v16 = vadd.f32 %v1536_v12, %v3276_v52  ;;  %v1538_v15 = vpop.f32.mrb[55].mxu1 }
 0x476   : > { %v2519_v27 = vpop.eup %2518  ;;  %2524 = vrcp.f32 %v1714_v41  ;;  %v1638_v20 = vmax.f32 %v3567_v42, 0.0  ;;  %v3577_v22 = vadd.f32 %v1538_v15, %v3278_v53  ;;  %v2572_v41 = vld [vmem:[%s3097_s29 + $0x90] sm:$0xff] }
 0x477   : > { %v1775_v23 = vmul.f32 %v2568_v43, %v2519_v27  ;;  %v1639_v24 = vmax.f32 %v3573_v16, 0.0 }
 0x478   : > { %v2521_v35 = vpop.eup %2520  ;;  %v1683_v45 = vadd.f32 %v1638_v20, %v1637_v62  ;;  %v1640_v47 = vmax.f32 %v3577_v22, 0.0 }
 0x479   : > { %v1821_v39 = vmul.f32 %v1775_v23, %v1629_v17  ;;  %v1822_v50 = vmul.f32 %v1775_v23, %v1630_v26  ;;  %v1776_v61 = vmul.f32 %v2569_v60, %v2521_v35 }
 0x47a   : > { %v1715_v63 = vadd.f32 1e-08, %v1683_v45  ;;  %v1684_v0 = vadd.f32 %v1640_v47, %v1639_v24  ;;  %v1542_v3 = vpop.f32.mrb[56].mxu1 }
 0x47b   : > { %1885 = vst [vmem:[%s3333_s16 + $0xe0] sm:$0xff] %v1821_v39  ;;  %1886 = vst [vmem:[%s3333_s16 + $0xe8] sm:$0xff] %v1822_v50  ;;  %v1823_v13 = vmul.f32 %v1776_v61, %v1631_v33  ;;  %v1824_v44 = vmul.f32 %v1776_v61, %v1632_v54  ;;  %v3602_v17 = vadd.f32 %v1542_v3, %v3276_v52  ;;  %v1544_v26 = vpop.f32.mrb[57].mxu1  ;;  %v2573_v39 = vld [vmem:[%s3097_s29 + $0x98] sm:$0xff] }
 0x47c   : > { %2526 = vrcp.f32 %v1715_v63  ;;  %v1716_v4 = vadd.f32 1e-08, %v1684_v0  ;;  %v3605_v5 = vadd.f32 %v1544_v26, %v3278_v53  ;;  %v1546_v28 = vpop.f32.mrb[58].mxu1 }
 0x47d   : > { %1887 = vst [vmem:[%s3333_s16 + $0xf0] sm:$0xff] %v1823_v13  ;;  %1888 = vst [vmem:[%s3333_s16 + $0xf8] sm:$0xff] %v1824_v44  ;;  %v1641_v30 = vmax.f32 %v3602_v17, 0.0  ;;  %v3611_v33 = vadd.f32 %v1546_v28, %v3276_v52  ;;  %v1548_v32 = vpop.f32.mrb[59].mxu1 }
 0x47e   : > { %v2523_v54 = vpop.eup %2522  ;;  %2528 = vrcp.f32 %v1716_v4  ;;  %v1642_v46 = vmax.f32 %v3605_v5, 0.0  ;;  %v3615_v6 = vadd.f32 %v1548_v32, %v3278_v53  ;;  %v2574_v4 = vld [vmem:[%s3097_s29 + $0xa0] sm:$0xff] }
 0x47f   : > { %v1777_v48 = vmul.f32 %v2570_v8, %v2523_v54  ;;  %v1643_v49 = vmax.f32 %v3611_v33, 0.0 }
 0x480   : > { %v2525_v1 = vpop.eup %2524  ;;  %v1685_v10 = vadd.f32 %v1642_v46, %v1641_v30  ;;  %v1644_v14 = vmax.f32 %v3615_v6, 0.0 }
 0x481   : > { %v1825_v2 = vmul.f32 %v1777_v48, %v1633_v36  ;;  %v1826_v18 = vmul.f32 %v1777_v48, %v1634_v51  ;;  %v1778_v25 = vmul.f32 %v2571_v19, %v2525_v1 }
 0x482   : > { %v1717_v31 = vadd.f32 1e-08, %v1685_v10  ;;  %v1686_v34 = vadd.f32 %v1644_v14, %v1643_v49  ;;  %v1552_v37 = vpop.f32.mrb[60].mxu1 }
 0x483   : > { %1889 = vst [vmem:[%s3333_s16 + $0x100] sm:$0xff] %v1825_v2  ;;  %1890 = vst [vmem:[%s3333_s16 + $0x108] sm:$0xff] %v1826_v18  ;;  %v1827_v29 = vmul.f32 %v1778_v25, %v1635_v59  ;;  %v1828_v9 = vmul.f32 %v1778_v25, %v1636_v21  ;;  %v3640_v36 = vadd.f32 %v1552_v37, %v3276_v52  ;;  %v1554_v51 = vpop.f32.mrb[61].mxu1  ;;  %v2575_v2 = vld [vmem:[%s3097_s29 + $0xa8] sm:$0xff] }
 0x484   : > { %2530 = vrcp.f32 %v1717_v31  ;;  %v1718_v38 = vadd.f32 1e-08, %v1686_v34  ;;  %v3643_v40 = vadd.f32 %v1554_v51, %v3278_v53  ;;  %v1556_v55 = vpop.f32.mrb[62].mxu1 }
 0x485   : > { %1891 = vst [vmem:[%s3333_s16 + $0x110] sm:$0xff] %v1827_v29  ;;  %1892 = vst [vmem:[%s3333_s16 + $0x118] sm:$0xff] %v1828_v9  ;;  %v1645_v57 = vmax.f32 %v3640_v36, 0.0  ;;  %v3649_v59 = vadd.f32 %v1556_v55, %v3276_v52  ;;  %v1558_v58 = vpop.f32.mrb[63].mxu1 }
 0x486   : > { %v2527_v21 = vpop.eup %2526  ;;  %2532 = vrcp.f32 %v1718_v38  ;;  %v1646_v11 = vmax.f32 %v3643_v40, 0.0  ;;  %v3653_v7 = vadd.f32 %v1558_v58, %v3278_v53  ;;  %v2576_v38 = vld [vmem:[%s3097_s29 + $0xb0] sm:$0xff] }
 0x487   : > { %v1779_v12 = vmul.f32 %v2572_v41, %v2527_v21  ;;  %v1647_v15 = vmax.f32 %v3649_v59, 0.0 }
 0x488   : > { %v2529_v27 = vpop.eup %2528  ;;  %v1687_v43 = vadd.f32 %v1646_v11, %v1645_v57  ;;  %v1648_v23 = vmax.f32 %v3653_v7, 0.0 }
 0x489   : > { %v1829_v35 = vmul.f32 %v1779_v12, %v1637_v62  ;;  %v1830_v45 = vmul.f32 %v1779_v12, %v1638_v20  ;;  %v1780_v50 = vmul.f32 %v2573_v39, %v2529_v27 }
 0x48a   : > { %v1719_v60 = vadd.f32 1e-08, %v1687_v43  ;;  %v1688_v61 = vadd.f32 %v1648_v23, %v1647_v15  ;;  %v1562_v63 = vpop.f32.mrb[64].mxu1 }
 0x48b   : > { %1893 = vst [vmem:[%s3333_s16 + $0x120] sm:$0xff] %v1829_v35  ;;  %1894 = vst [vmem:[%s3333_s16 + $0x128] sm:$0xff] %v1830_v45  ;;  %v1831_v56 = vmul.f32 %v1780_v50, %v1639_v24  ;;  %v1832_v42 = vmul.f32 %v1780_v50, %v1640_v47  ;;  %v3678_v62 = vadd.f32 %v1562_v63, %v3276_v52  ;;  %v1564_v20 = vpop.f32.mrb[65].mxu1  ;;  %v2577_v35 = vld [vmem:[%s3097_s29 + $0xb8] sm:$0xff] }
 0x48c   : > { %2534 = vrcp.f32 %v1719_v60  ;;  %v1720_v0 = vadd.f32 1e-08, %v1688_v61  ;;  %v3681_v3 = vadd.f32 %v1564_v20, %v3278_v53  ;;  %v1566_v13 = vpop.f32.mrb[66].mxu1 }
 0x48d   : > { %1895 = vst [vmem:[%s3333_s16 + $0x130] sm:$0xff] %v1831_v56  ;;  %1896 = vst [vmem:[%s3333_s16 + $0x138] sm:$0xff] %v1832_v42  ;;  %v1649_v16 = vmax.f32 %v3678_v62, 0.0  ;;  %v3687_v24 = vadd.f32 %v1566_v13, %v3276_v52  ;;  %v1568_v22 = vpop.f32.mrb[67].mxu1 }
 0x48e   : > { %v2531_v47 = vpop.eup %2530  ;;  %2536 = vrcp.f32 %v1720_v0  ;;  %v1650_v44 = vmax.f32 %v3681_v3, 0.0  ;;  %v3691_v26 = vadd.f32 %v1568_v22, %v3278_v53  ;;  %v2578_v0 = vld [vmem:[%s3097_s29 + $0xc0] sm:$0xff] }
 0x48f   : > { %v1781_v28 = vmul.f32 %v2574_v4, %v2531_v47  ;;  %v1651_v32 = vmax.f32 %v3687_v24, 0.0 }
 0x490   : > { %v2533_v54 = vpop.eup %2532  ;;  %v1689_v8 = vadd.f32 %v1650_v44, %v1649_v16  ;;  %v1652_v48 = vmax.f32 %v3691_v26, 0.0 }
 0x491   : > { %v1833_v1 = vmul.f32 %v1781_v28, %v1641_v30  ;;  %v1834_v10 = vmul.f32 %v1781_v28, %v1642_v46  ;;  %v1782_v18 = vmul.f32 %v2575_v2, %v2533_v54 }
 0x492   : > { %v1721_v19 = vadd.f32 1e-08, %v1689_v8  ;;  %v1690_v25 = vadd.f32 %v1652_v48, %v1651_v32  ;;  %v1572_v31 = vpop.f32.mrb[68].mxu1 }
 0x493   : > { %1897 = vst [vmem:[%s3333_s16 + $0x140] sm:$0xff] %v1833_v1  ;;  %1898 = vst [vmem:[%s3333_s16 + $0x148] sm:$0xff] %v1834_v10  ;;  %v1835_v17 = vmul.f32 %v1782_v18, %v1643_v49  ;;  %v1836_v5 = vmul.f32 %v1782_v18, %v1644_v14  ;;  %v3716_v30 = vadd.f32 %v1572_v31, %v3276_v52  ;;  %v1574_v46 = vpop.f32.mrb[69].mxu1  ;;  %v2579_v1 = vld [vmem:[%s3097_s29 + $0xc8] sm:$0xff] }
 0x494   : > { %2538 = vrcp.f32 %v1721_v19  ;;  %v1722_v34 = vadd.f32 1e-08, %v1690_v25  ;;  %v3719_v37 = vadd.f32 %v1574_v46, %v3278_v53  ;;  %v1576_v29 = vpop.f32.mrb[70].mxu1 }
 0x495   : > { %1899 = vst [vmem:[%s3333_s16 + $0x150] sm:$0xff] %v1835_v17  ;;  %1900 = vst [vmem:[%s3333_s16 + $0x158] sm:$0xff] %v1836_v5  ;;  %v1653_v33 = vmax.f32 %v3716_v30, 0.0  ;;  %v3725_v49 = vadd.f32 %v1576_v29, %v3276_v52  ;;  %v1578_v6 = vpop.f32.mrb[71].mxu1 }
 0x496   : > { %v2535_v14 = vpop.eup %2534  ;;  %2540 = vrcp.f32 %v1722_v34  ;;  %v1654_v9 = vmax.f32 %v3719_v37, 0.0  ;;  %v3729_v51 = vadd.f32 %v1578_v6, %v3278_v53  ;;  %v2580_v34 = vld [vmem:[%s3097_s29 + $0xd0] sm:$0xff] }
 0x497   : > { %v1783_v55 = vmul.f32 %v2576_v38, %v2535_v14  ;;  %v1655_v58 = vmax.f32 %v3725_v49, 0.0 }
 0x498   : > { %v2537_v21 = vpop.eup %2536  ;;  %v1691_v41 = vadd.f32 %v1654_v9, %v1653_v33  ;;  %v1656_v12 = vmax.f32 %v3729_v51, 0.0 }
 0x499   : > { %v1837_v27 = vmul.f32 %v1783_v55, %v1645_v57  ;;  %v1838_v43 = vmul.f32 %v1783_v55, %v1646_v11  ;;  %v1784_v45 = vmul.f32 %v2577_v35, %v2537_v21 }
 0x49a   : > { %v1723_v39 = vadd.f32 1e-08, %v1691_v41  ;;  %v1692_v50 = vadd.f32 %v1656_v12, %v1655_v58  ;;  %v1582_v60 = vpop.f32.mrb[72].mxu1  ;;  %v2581_v41 = vld [vmem:[%s3097_s29 + $0xd8] sm:$0xff] }
 0x49b   : > { %1901 = vst [vmem:[%s3333_s16 + $0x160] sm:$0xff] %v1837_v27  ;;  %1902 = vst [vmem:[%s3333_s16 + $0x168] sm:$0xff] %v1838_v43  ;;  %v1839_v36 = vmul.f32 %v1784_v45, %v1647_v15  ;;  %v1840_v40 = vmul.f32 %v1784_v45, %v1648_v23  ;;  %v3754_v57 = vadd.f32 %v1582_v60, %v3276_v52  ;;  %v1584_v11 = vpop.f32.mrb[73].mxu1 }
 0x49c   : > { %2542 = vrcp.f32 %v1723_v39  ;;  %v1724_v61 = vadd.f32 1e-08, %v1692_v50  ;;  %v3757_v63 = vadd.f32 %v1584_v11, %v3278_v53  ;;  %v1586_v56 = vpop.f32.mrb[74].mxu1  ;;  %v2583_v39 = vld [vmem:[%s3097_s29 + $0xe8] sm:$0xff] }
 0x49d   : > { %1903 = vst [vmem:[%s3333_s16 + $0x170] sm:$0xff] %v1839_v36  ;;  %1904 = vst [vmem:[%s3333_s16 + $0x178] sm:$0xff] %v1840_v40  ;;  %v1657_v59 = vmax.f32 %v3754_v57, 0.0  ;;  %v3763_v15 = vadd.f32 %v1586_v56, %v3276_v52  ;;  %v1588_v7 = vpop.f32.mrb[75].mxu1  ;;  %v2584_v40 = vld [vmem:[%s3097_s29 + $0xf0] sm:$0xff]  ;;  %v2585_v56 = vld [vmem:[%s3097_s29 + $0xf8] sm:$0xff] }
 0x49e   : > { %v2539_v23 = vpop.eup %2538  ;;  %2544 = vrcp.f32 %v1724_v61  ;;  %v1658_v42 = vmax.f32 %v3757_v63, 0.0  ;;  %v3767_v20 = vadd.f32 %v1588_v7, %v3278_v53 }
 0x49f   : > { %v1785_v13 = vmul.f32 %v2578_v0, %v2539_v23  ;;  %v1659_v22 = vmax.f32 %v3763_v15, 0.0 }
 0x4a0   : > { %v2541_v47 = vpop.eup %2540  ;;  %v1693_v4 = vadd.f32 %v1658_v42, %v1657_v59  ;;  %v1660_v28 = vmax.f32 %v3767_v20, 0.0 }
 0x4a1   : > { %v1841_v54 = vmul.f32 %v1785_v13, %v1649_v16  ;;  %v1842_v8 = vmul.f32 %v1785_v13, %v1650_v44  ;;  %v1786_v10 = vmul.f32 %v2579_v1, %v2541_v47 }
 0x4a2   : > { %v1725_v2 = vadd.f32 1e-08, %v1693_v4  ;;  %v1694_v18 = vadd.f32 %v1660_v28, %v1659_v22  ;;  %v1592_v19 = vpop.f32.mrb[76].mxu1 }
 0x4a3   : > { %1905 = vst [vmem:[%s3333_s16 + $0x180] sm:$0xff] %v1841_v54  ;;  %1906 = vst [vmem:[%s3333_s16 + $0x188] sm:$0xff] %v1842_v8  ;;  %v1843_v25 = vmul.f32 %v1786_v10, %v1651_v32  ;;  %v1844_v31 = vmul.f32 %v1786_v10, %v1652_v48  ;;  %v1593_v62 = vadd.f32 %v1592_v19, %v3276_v52  ;;  %v1594_v3 = vpop.f32.mrb[77].mxu1 }
 0x4a4   : > { %2546 = vrcp.f32 %v1725_v2  ;;  %v1726_v16 = vadd.f32 1e-08, %v1694_v18  ;;  %v1595_v44 = vadd.f32 %v1594_v3, %v3278_v53  ;;  %v1596_v17 = vpop.f32.mrb[78].mxu1 }
 0x4a5   : > { %1907 = vst [vmem:[%s3333_s16 + $0x190] sm:$0xff] %v1843_v25  ;;  %1908 = vst [vmem:[%s3333_s16 + $0x198] sm:$0xff] %v1844_v31  ;;  %v1661_v5 = vmax.f32 %v1593_v62, 0.0  ;;  %v1597_v46 = vadd.f32 %v1596_v17, %v3276_v52  ;;  %v1598_v24 = vpop.f32.mrb[79].mxu1 }
 0x4a6   : > { %v2543_v32 = vpop.eup %2542  ;;  %2548 = vrcp.f32 %v1726_v16  ;;  %v1662_v26 = vmax.f32 %v1595_v44, 0.0  ;;  %v1599_v48 = vadd.f32 %v1598_v24, %v3278_v53 }
 0x4a7   : > { %v1787_v29 = vmul.f32 %v2580_v34, %v2543_v32  ;;  %v1663_v6 = vmax.f32 %v1597_v46, 0.0 }
 0x4a8   : > { %v2545_v14 = vpop.eup %2544  ;;  %v1695_v38 = vadd.f32 %v1662_v26, %v1661_v5  ;;  %v1664_v55 = vmax.f32 %v1599_v48, 0.0 }
 0x4a9   : > { %v1845_v21 = vmul.f32 %v1787_v29, %v1653_v33  ;;  %v1846_v52 = vmul.f32 %v1787_v29, %v1654_v9  ;;  %v1788_v27 = vmul.f32 %v2581_v41, %v2545_v14  ;;  %v2582_v9 = vld [vmem:[%s3097_s29 + $0xe0] sm:$0xff]  ;;  %s2814_s29 = smov [#allocation11]  }
 0x4aa   : > { %v1727_v43 = vadd.f32 1e-08, %v1695_v38  ;;  %v1696_v35 = vadd.f32 %v1664_v55, %v1663_v6  ;;  %s2732_s19 = sshll.u32 %s2814_s29, 4  ;;  %s2733_s19 = int_to_ptr.vmem [resolvable:$false] %s2732_s19 }
 0x4ab   : > { %1909 = vst [vmem:[%s3333_s16 + $0x1a0] sm:$0xff] %v1845_v21  ;;  %1910 = vst [vmem:[%s3333_s16 + $0x1a8] sm:$0xff] %v1846_v52  ;;  %v1847_v53 = vmul.f32 %v1788_v27, %v1655_v58  ;;  %v1848_v30 = vmul.f32 %v1788_v27, %v1656_v12  ;;  %s2734_s26 = scalar_lea.vmem %s2733_s19, 16384  ;;  %p2735_p12 = scmp.lt.s32.totalorder %s3822_s21, %s2733_s19 }
 0x4ac   : > { %2550 = vrcp.f32 %v1727_v43  ;;  %v1728_v33 = vadd.f32 1e-08, %v1696_v35  ;;  %p2736_p1 = scmp.lt.s32.totalorder %s2734_s26, %s2728_s14 }
 0x4ad   : > { %1911 = vst [vmem:[%s3333_s16 + $0x1b0] sm:$0xff] %v1847_v53  ;;  %1912 = vst [vmem:[%s3333_s16 + $0x1b8] sm:$0xff] %v1848_v30 }
 0x4ae   : > { %v2547_v37 = vpop.eup %2546  ;;  %2552 = vrcp.f32 %v1728_v33  ;;  %p2737_p2 = por %p2736_p1, %p2735_p12 }
 0x4af   : > { %v1789_v45 = vmul.f32 %v2582_v9, %v2547_v37 }
 0x4b0   : > { %v2549_v49 = vpop.eup %2548  ;;  %p2738_p13 = pnand %p2737_p2, %p2731_p7 }
 0x4b1   : > { %v1849_v58 = vmul.f32 %v1789_v45, %v1657_v59  ;;  %v1850_v51 = vmul.f32 %v1789_v45, %v1658_v42  ;;  %v1790_v12 = vmul.f32 %v2583_v39, %v2549_v49 }
 0x4b3   : > { %1913 = vst [vmem:[%s3333_s16 + $0x1c0] sm:$0xff] %v1849_v58  ;;  %1914 = vst [vmem:[%s3333_s16 + $0x1c8] sm:$0xff] %v1850_v51  ;;  %v1851_v50 = vmul.f32 %v1790_v12, %v1659_v22  ;;  %v1852_v60 = vmul.f32 %v1790_v12, %v1660_v28 }
 0x4b5   : > { %1915 = vst [vmem:[%s3333_s16 + $0x1d0] sm:$0xff] %v1851_v50  ;;  %1916 = vst [vmem:[%s3333_s16 + $0x1d8] sm:$0xff] %v1852_v60 }
 0x4b6   : > { %v2551_v36 = vpop.eup %2550 }
 0x4b7   : > { %v1791_v11 = vmul.f32 %v2584_v40, %v2551_v36 }
 0x4b8   : > { %v2553_v57 = vpop.eup %2552 }
 0x4b9   : > { %v1853_v61 = vmul.f32 %v1791_v11, %v1661_v5  ;;  %v1854_v63 = vmul.f32 %v1791_v11, %v1662_v26  ;;  %v1792_v59 = vmul.f32 %v2585_v56, %v2553_v57 }
 0x4bb   : > { %1917 = vst [vmem:[%s3333_s16 + $0x1e0] sm:$0xff] %v1853_v61  ;;  %1918 = vst [vmem:[%s3333_s16 + $0x1e8] sm:$0xff] %v1854_v63  ;;  %v1855_v15 = vmul.f32 %v1792_v59, %v1663_v6  ;;  %v1856_v7 = vmul.f32 %v1792_v59, %v1664_v55 }
 0x4bd   : > { %1919 = vst [vmem:[%s3333_s16 + $0x1f0] sm:$0xff] %v1855_v15  ;;  %1920 = vst [vmem:[%s3333_s16 + $0x1f8] sm:$0xff] %v1856_v7 }
 0x4be   : > { %2741 = shalt.err (!%p2738_p13)
}
 0x4bf   : > { %s2742_s22 = scalar_lea.hbm %s3820_s25, 8192  ;;  %s2746_s16 = scalar_lea.hbm %s3903_s17, 16384 }
 0x4c0   : > { %p2743_p9 = scmp.ne.s32.totalorder %s3820_s25, %s2742_s22  ;;  %p2747_p4 = scmp.lt.u32.totalorder %s3820_s25, %s3903_s17 }
 0x4c1   : > { %p2748_p8 = scmp.lt.u32.totalorder %s2746_s16, %s2742_s22  ;;  %p2750_p10 = scmp.lt.u32.totalorder %s2742_s22, %s3820_s25 }
 0x4c2   : > { %p2744_p0 = pnand %p2743_p9, %p3041_p3 }
 0x4c3   : > { %p2749_p6 = por %p2748_p8, %p2747_p4 }
 0x4c4   : > { %p2745_p11 = pneg %p2744_p0 }
 0x4c5   : > { %p2751_p5 = por %p2750_p10, %p2749_p6 }
 0x4c7   : > { %p2752_p7 = pnand %p2751_p5, %p2745_p11 }
 0x4c9   : > { %2755 = shalt.err (!%p2752_p7)
}
 0x4ca   : > { %s2815_s15 = smov 256   ;;  %s2816_s14 = smov 16  }
 0x4cb   : > { %2366 = dma.vmem_to_hbm [thread:$0]  (%p3041_p3), %s3822_s21, 8192, %s3820_s25, %s1922_s13, %s2815_s15, %s2815_s15, %s2816_s14  }
 0x4cc PF: > { %s3904_s29 = sld [smem:[#allocation16_spill]]  ;;  %s3905_s19 = sld [smem:[#allocation17_spill]] }
 0x4cd   : > { %p3907_p1 = scmp.ge.s32.totalorder %s2802_s12, 2 }
 0x4d2   : > { %s1951_s26 = sand.u32 1, %s3904_s29   ;;  %p3906_p12 = scmp.ne.s32.totalorder %s3905_s19, 0 }
 0x4d3   : > { %s1952_s22 = scalar_lea.sflag [#allocation4], %s1951_s26 }
 0x4d4   : > { %p2386_p2 = pnand %p3907_p1, %p3906_p12 }
 0x4d6   : > { %2785 = dma.done.wait (!%p2386_p2), %s1952_s22, 8192  }
 0x4d7   : > { %2787 = vsyncadd (!%p2386_p2), %s1952_s22, 4294959104  ;;  %p24_p13 = scmp.ge.s32.totalorder %s3028_s9, 4   ;;  %s3908_s30 = smov %s2794_s10 }
 0x4d8   : > { %s3909_s10 = smov %s2798_s11  ;;  %s3910_s11 = smov %s3037_s28 }
 0x4d9   : > { %s3911_s12 = smov %s3028_s9  ;;  %26 = sbr.rel (!%p24_p13) target bundleno = 9 (0x9), region = 117 }
 0x4e0   :  { %1957 = vsyncpa [#allocation3], 1 }
 0x4e1   :  { %1959 = vsyncpa [#allocation3 + $0x1], 1 }
 0x4e2   :  { %1960 = vsyncpa [#allocation6], 1 }
 0x4e3   :  { %1961 = vsyncpa [#allocation9], 1 }
 0x4e4   :  { %1962 = vsyncpa [#allocation4], 1 }
 0x4e5   :  { %1964 = vsyncpa [#allocation4 + $0x1], 1 }

</bundles_post_ra>
